<compile_context>
chip_gen: v6e
topology: v6e:2x2x1
jax: 0.10.0
libtpu: 0.0.40
codegen_flags: <defaults>
</compile_context>

<pallas_src>
import math
import numpy as np
import jax
import jax.numpy as jnp
from jax.experimental import pallas as pl

# ----------------------------- configuration --------------------------------
B, S = 2, 8                 # batch, sequence length
N_HEAD = 4
D_KEY = 8
D_VALUE = 8
D_MODEL = 32
D_INNER = 64
LN_EPS = 1e-7
SCALE = 1.0 / math.sqrt(D_KEY)

N = N_HEAD * B              # fused (head, batch) attention dim, n = h*B + b
SK = S * S                  # expanded key axis, k = i'*S + j
NEG = -1e9                  # additive mask value for i' != i
VEC_PAD = 64                # lane width of the packed small-vector slab

# rows of the packed vector slab
_BP, _G1, _BETA1, _B1, _B2, _G2, _BETA2 = range(7)


# ------------------------------ kernel helpers -------------------------------
def _erf_approx(x):
    # Abramowitz & Stegun 7.1.26, |abs error| < 1.5e-7.
    a1, a2, a3, a4, a5 = 0.254829592, -0.284496736, 1.421413741, -1.453152027, 1.061405429
    p = 0.3275911
    ax = jnp.abs(x)
    t = 1.0 / (1.0 + p * ax)
    poly = ((((a5 * t + a4) * t + a3) * t + a2) * t + a1) * t
    y = 1.0 - poly * jnp.exp(-ax * ax)
    return jnp.where(x >= 0, y, -y)


def _gelu_exact(x):
    # torch.nn.GELU() default (exact, erf-based)
    return 0.5 * x * (1.0 + _erf_approx(x * (1.0 / math.sqrt(2.0))))


def _layer_norm(z, gamma, beta):
    mu = jnp.mean(z, axis=-1, keepdims=True)
    var = jnp.mean((z - mu) ** 2, axis=-1, keepdims=True)
    return (z - mu) * jax.lax.rsqrt(var + LN_EPS) * gamma + beta


def _bmm(a, b):
    """(G, M, K) @ (G, K, P) -> (G, M, P), batched matmul on the MXU."""
    return jax.lax.dot_general(a, b, (((2,), (1,)), ((0,), (0,))),
                               preferred_element_type=jnp.float32)


def _bmm_nt(a, b):
    """(G, M, K) @ (G, P, K)^T -> (G, M, P), contract last dims (MXU)."""
    return jax.lax.dot_general(a, b, (((2,), (2,)), ((0,), (0,))),
                               preferred_element_type=jnp.float32)


# --------------------------------- kernel ------------------------------------
def encoder_layer_kernel(enc_ref, ek2_ref, ev2_ref, bias_ref, expand_ref,
                         wqkv_ref, bqkv_ref, wp_ref, w1_ref, w2_ref, vec_ref,
                         out_ref):
    x = enc_ref[...]                                        # (B, S, D)

    # --- replicate activations over heads / weights over batch.
    # Only leading-dim broadcasts + reshapes (last two dims always unchanged).
    x_n = jnp.broadcast_to(x[None], (N_HEAD, B, S, D_MODEL)).reshape(N, S, D_MODEL)

    def head_w(idx):   # (H, D, dk) -> (N, D, dk)
        w = wqkv_ref[idx]
        return jnp.broadcast_to(w[:, None], (N_HEAD, B, D_MODEL, D_KEY)
                                ).reshape(N, D_MODEL, D_KEY)

    def head_b(idx):   # (H, dk) -> (N, 1, dk)
        b = bqkv_ref[idx]
        return jnp.broadcast_to(b[:, None, None], (N_HEAD, B, 1, D_KEY)
                                ).reshape(N, 1, D_KEY)

    # --- QKV projections, batched over n = (head, batch) on the MXU ----------
    q = _bmm(x_n, head_w(0)) + head_b(0)                    # (N, S, dk)
    k = _bmm(x_n, head_w(1)) + head_b(1)                    # (N, S, dk)
    v = _bmm(x_n, head_w(2)) + head_b(2)                    # (N, S, dv)
    q = q * SCALE                                           # fold 1/sqrt(dk) once

    # --- relational attention in the expanded key space k = (i', j) ----------
    # expand: (SK, S) 0/1 matrix with expand[i'*S+j, j'] = delta(j, j')
    expand = jnp.broadcast_to(expand_ref[...][None], (N, SK, S))
    k_comb = _bmm(expand, k) + jnp.broadcast_to(ek2_ref[...][None], (N, SK, D_KEY))
    v_comb = _bmm(expand, v) + jnp.broadcast_to(ev2_ref[...][None], (N, SK, D_VALUE))

    # scores[n, i, (i',j)] = <q_ni, k_nj + ek_{i'j}> + bias[n,i,j] + mask(i'!=i)
    sc = _bmm_nt(q, k_comb) + bias_ref[...]                 # (N, S, SK)
    m = jnp.max(sc, axis=-1, keepdims=True)
    e = jnp.exp(sc - m)
    w = e * pl.reciprocal(jnp.sum(e, axis=-1, keepdims=True), approx=True)

    # masked entries of w are exactly zero, so one matmul yields context1+context2
    ctx = _bmm(w, v_comb)                                   # (N, S, dv)

    # --- output projection per head, reduce over heads (== concat + matmul) --
    wp_n = jnp.broadcast_to(wp_ref[...][:, None], (N_HEAD, B, D_VALUE, D_MODEL)
                            ).reshape(N, D_VALUE, D_MODEL)
    p_n = _bmm(ctx, wp_n)                                   # (N, S, D)
    attn = jnp.sum(p_n.reshape(N_HEAD, B, S, D_MODEL), axis=0)   # (B, S, D)
    attn = attn + vec_ref[_BP:_BP + 1, 0:D_MODEL]
    # TODO(synk): attention_dropout / prepostprocess_dropout treated as identity.

    # --- residual + LayerNorm 1 ----------------------------------------------
    y = _layer_norm(x + attn,
                    vec_ref[_G1:_G1 + 1, 0:D_MODEL],
                    vec_ref[_BETA1:_BETA1 + 1, 0:D_MODEL])

    # --- position-wise FFN (exact GELU), batched over B -----------------------
    w1_b = jnp.broadcast_to(w1_ref[...][None], (B, D_MODEL, D_INNER))
    w2_b = jnp.broadcast_to(w2_ref[...][None], (B, D_INNER, D_MODEL))
    h1 = _bmm(y, w1_b) + vec_ref[_B1:_B1 + 1, 0:D_INNER]
    h1 = _gelu_exact(h1)
    ff = _bmm(h1, w2_b) + vec_ref[_B2:_B2 + 1, 0:D_MODEL]

    # --- residual + LayerNorm 2 ----------------------------------------------
    out_ref[...] = _layer_norm(y + ff,
                               vec_ref[_G2:_G2 + 1, 0:D_MODEL],
                               vec_ref[_BETA2:_BETA2 + 1, 0:D_MODEL])


# -------------------------------- wrapper ------------------------------------
def encoder_layer(enc, edges_key, edges_value, attn_bias, p):
    """Whole encoder layer in a single pallas_call invocation (no grid)."""
    # ---- layout plumbing (host / XLA side, all tiny) ----
    # head-stacked QKV weights / biases: w[h, m, d] = W[m, h*dk + d]
    def heads(w):
        return w.reshape(D_MODEL, N_HEAD, -1).transpose(1, 0, 2)

    wqkv = jnp.stack([heads(p["wq"]), heads(p["wk"]), heads(p["wv"])])   # (3,H,D,dk)
    bqkv = jnp.stack([p["bq"].reshape(N_HEAD, D_KEY),
                      p["bk"].reshape(N_HEAD, D_KEY),
                      p["bv"].reshape(N_HEAD, D_VALUE)])                  # (3,H,dk)
    wp_h = p["wp"].reshape(N_HEAD, D_VALUE, D_MODEL)                      # (H,dv,D)

    def pad_row(v):
        v = v.reshape(-1)
        return jnp.pad(v, (0, VEC_PAD - v.shape[0]))

    vec_slab = jnp.stack([pad_row(p[name]) for name in
                          ("bp", "g1", "beta1", "b1", "b2", "g2", "beta2")])  # (7,64)

    # expanded-key-space constants
    ek2 = edges_key.reshape(SK, D_KEY)                     # ek2[i'*S+j, d] = ek[i',j,d]
    ev2 = edges_value.reshape(SK, D_VALUE)
    expand = jnp.asarray(np.tile(np.eye(S, dtype=np.float32), (S, 1)))    # (SK, S)

    # additive attention bias (n = h*B + b) + block-diagonal mask over (i', j)
    bias_n = attn_bias.transpose(1, 0, 2, 3).reshape(N, S, S)
    ii = np.arange(S)
    mask = np.where(ii[:, None, None] == ii[None, :, None], 0.0, NEG)     # (S,S',1)
    mask = np.broadcast_to(mask, (S, S, S)).reshape(S, SK).astype(np.float32)
    bias_em = jnp.tile(bias_n, (1, 1, S)) + mask[None]                    # (N,S,SK)

    return pl.pallas_call(
        encoder_layer_kernel,
        out_shape=jax.ShapeDtypeStruct((B, S, D_MODEL), jnp.float32),
    )(enc, ek2, ev2, bias_em, expand, wqkv, bqkv, wp_h, p["w1"], p["w2"], vec_slab)


# --------------------------- parameter construction --------------------------
def init_params(key):
    ks = jax.random.split(key, 6)

    def trunc(k, shape, std=0.02):
        # mirrors truncated_normal(mean=0, std=0.02) clipped to +-2*std
        return jax.random.truncated_normal(k, -2.0, 2.0, shape, jnp.float32) * std

    return dict(
        wq=trunc(ks[0], (D_MODEL, N_HEAD * D_KEY)),
        bq=jnp.zeros((1, N_HEAD * D_KEY), jnp.float32),
        wk=trunc(ks[1], (D_MODEL, N_HEAD * D_KEY)),
        bk=jnp.zeros((1, N_HEAD * D_KEY), jnp.float32),
        wv=trunc(ks[2], (D_MODEL, N_HEAD * D_VALUE)),
        bv=jnp.zeros((1, N_HEAD * D_VALUE), jnp.float32),
        wp=trunc(ks[3], (N_HEAD * D_VALUE, D_MODEL)),
        bp=jnp.zeros((1, D_MODEL), jnp.float32),
        g1=jnp.ones((1, D_MODEL), jnp.float32),
        beta1=jnp.zeros((1, D_MODEL), jnp.float32),
        w1=trunc(ks[4], (D_MODEL, D_INNER)),
        b1=jnp.zeros((1, D_INNER), jnp.float32),
        w2=trunc(ks[5], (D_INNER, D_MODEL)),
        b2=jnp.zeros((1, D_MODEL), jnp.float32),
        g2=jnp.ones((1, D_MODEL), jnp.float32),
        beta2=jnp.zeros((1, D_MODEL), jnp.float32),
    )


# ------------------------------ pure-JAX reference ---------------------------
def reference(enc, ek, ev, bias, p):
    q = (enc @ p["wq"] + p["bq"]).reshape(B, S, N_HEAD, D_KEY).transpose(0, 2, 1, 3)
    k = (enc @ p["wk"] + p["bk"]).reshape(B, S, N_HEAD, D_KEY).transpose(0, 2, 1, 3)
    v = (enc @ p["wv"] + p["bv"]).reshape(B, S, N_HEAD, D_VALUE).transpose(0, 2, 1, 3)

    s1 = jnp.einsum("bhid,bhjd->bhij", q, k) * SCALE
    s2 = jnp.einsum("bhid,ijd->bhij", q, ek) * SCALE
    w = jax.nn.softmax(s1 + s2 + bias, axis=-1)

    c1 = jnp.einsum("bhij,bhjd->bhid", w, v)
    c2 = jnp.einsum("bhij,ijd->bhid", w, ev)
    ctx = (c1 + c2).transpose(0, 2, 1, 3).reshape(B, S, N_HEAD * D_VALUE)
    attn_out = ctx @ p["wp"] + p["bp"]

    y = _layer_norm(enc + attn_out, p["g1"], p["beta1"])
    ff = jax.nn.gelu(y @ p["w1"] + p["b1"], approximate=False) @ p["w2"] + p["b2"]
    return _layer_norm(y + ff, p["g2"], p["beta2"])


# ----------------------------------- main -------------------------------------
if __name__ == "__main__":
    key = jax.random.PRNGKey(0)
    k_enc, k_ek, k_ev, k_bias, k_param = jax.random.split(key, 5)

    enc_input = jax.random.normal(k_enc, (B, S, D_MODEL), jnp.float32)
    edges_key = jax.random.normal(k_ek, (S, S, D_KEY), jnp.float32) * 0.1
    edges_value = jax.random.normal(k_ev, (S, S, D_VALUE), jnp.float32) * 0.1
    attn_bias = jax.random.normal(k_bias, (B, N_HEAD, S, S), jnp.float32) * 0.1

    params = init_params(k_param)

    out = encoder_layer(enc_input, edges_key, edges_value, attn_bias, params)
    out = jax.block_until_ready(out)

    ref = reference(enc_input, edges_key, edges_value, attn_bias, params)
    assert out.shape == (B, S, D_MODEL)
    if not jnp.allclose(out, ref, atol=5e-3, rtol=5e-3):
        raise AssertionError(
            f"kernel/reference mismatch, max abs err = {jnp.max(jnp.abs(out - ref))}")

    print("KERNEL_OK")
</pallas_src>

<mosaic_0001>
module attributes {stable_mosaic.version = 11 : i64} {
  func.func @encoder_layer_kernel(%arg0: memref<2x8x32xf32, #tpu.memory_space<vmem>>, %arg1: memref<64x8xf32, #tpu.memory_space<vmem>>, %arg2: memref<64x8xf32, #tpu.memory_space<vmem>>, %arg3: memref<8x8x64xf32, #tpu.memory_space<vmem>>, %arg4: memref<64x8xf32, #tpu.memory_space<vmem>>, %arg5: memref<3x4x32x8xf32, #tpu.memory_space<vmem>>, %arg6: memref<3x4x8xf32, #tpu.memory_space<vmem>>, %arg7: memref<4x8x32xf32, #tpu.memory_space<vmem>>, %arg8: memref<32x64xf32, #tpu.memory_space<vmem>>, %arg9: memref<64x32xf32, #tpu.memory_space<vmem>>, %arg10: memref<7x64xf32, #tpu.memory_space<vmem>>, %arg11: memref<2x8x32xf32, #tpu.memory_space<vmem>>) attributes {dimension_semantics = [], scalar_prefetch = 0 : i64, scratch_operands = 0 : i64, tpu.core_type = #tpu.core_type<tc>} {
    %c0 = arith.constant 0 : index
    %c0_0 = arith.constant 0 : index
    %c0_1 = arith.constant 0 : index
    %0 = vector.load %arg0[%c0, %c0_0, %c0_1] : memref<2x8x32xf32, #tpu.memory_space<vmem>>, vector<2x8x32xf32>
    %1 = vector.shape_cast %0 : vector<2x8x32xf32> to vector<1x2x8x32xf32>
    %2 = vector.shape_cast %1 : vector<1x2x8x32xf32> to vector<1x2x8x32xf32>
    %3 = vector.broadcast %2 : vector<1x2x8x32xf32> to vector<4x2x8x32xf32>
    %4 = vector.shape_cast %3 : vector<4x2x8x32xf32> to vector<8x8x32xf32>
    %c0_2 = arith.constant 0 : index
    %c0_3 = arith.constant 0 : index
    %c0_4 = arith.constant 0 : index
    %c0_5 = arith.constant 0 : index
    %5 = vector.load %arg5[%c0_2, %c0_3, %c0_4, %c0_5] : memref<3x4x32x8xf32, #tpu.memory_space<vmem>>, vector<1x4x32x8xf32>
    %6 = vector.shape_cast %5 : vector<1x4x32x8xf32> to vector<4x32x8xf32>
    %7 = vector.shape_cast %6 : vector<4x32x8xf32> to vector<4x1x32x8xf32>
    %8 = vector.shape_cast %7 : vector<4x1x32x8xf32> to vector<4x1x32x8xf32>
    %9 = vector.broadcast %8 : vector<4x1x32x8xf32> to vector<4x2x32x8xf32>
    %10 = vector.shape_cast %9 : vector<4x2x32x8xf32> to vector<8x32x8xf32>
    %cst = arith.constant dense<0.000000e+00> : vector<8x8x8xf32>
    %11 = tpu.matmul %4, %10, %cst {dimension_numbers = #tpu.dot_dimension_numbers<[2], [1], [1], [2], [0, 0, 0, 1, 1, 2], [0], [0]>} : vector<8x8x32xf32>, vector<8x32x8xf32>, vector<8x8x8xf32> -> vector<8x8x8xf32>
    %c0_6 = arith.constant 0 : index
    %c0_7 = arith.constant 0 : index
    %c0_8 = arith.constant 0 : index
    %12 = vector.load %arg6[%c0_6, %c0_7, %c0_8] : memref<3x4x8xf32, #tpu.memory_space<vmem>>, vector<1x4x8xf32>
    %13 = vector.shape_cast %12 : vector<1x4x8xf32> to vector<4x8xf32>
    %14 = vector.shape_cast %13 : vector<4x8xf32> to vector<4x1x1x8xf32>
    %15 = vector.shape_cast %14 : vector<4x1x1x8xf32> to vector<4x1x1x8xf32>
    %16 = vector.broadcast %15 : vector<4x1x1x8xf32> to vector<4x2x1x8xf32>
    %17 = vector.shape_cast %16 : vector<4x2x1x8xf32> to vector<8x1x8xf32>
    %18 = vector.broadcast %17 : vector<8x1x8xf32> to vector<8x8x8xf32>
    %19 = arith.addf %11, %18 : vector<8x8x8xf32>
    %c1 = arith.constant 1 : index
    %c0_9 = arith.constant 0 : index
    %c0_10 = arith.constant 0 : index
    %c0_11 = arith.constant 0 : index
    %20 = vector.load %arg5[%c1, %c0_9, %c0_10, %c0_11] : memref<3x4x32x8xf32, #tpu.memory_space<vmem>>, vector<1x4x32x8xf32>
    %21 = vector.shape_cast %20 : vector<1x4x32x8xf32> to vector<4x32x8xf32>
    %22 = vector.shape_cast %21 : vector<4x32x8xf32> to vector<4x1x32x8xf32>
    %23 = vector.shape_cast %22 : vector<4x1x32x8xf32> to vector<4x1x32x8xf32>
    %24 = vector.broadcast %23 : vector<4x1x32x8xf32> to vector<4x2x32x8xf32>
    %25 = vector.shape_cast %24 : vector<4x2x32x8xf32> to vector<8x32x8xf32>
    %cst_12 = arith.constant dense<0.000000e+00> : vector<8x8x8xf32>
    %26 = tpu.matmul %4, %25, %cst_12 {dimension_numbers = #tpu.dot_dimension_numbers<[2], [1], [1], [2], [0, 0, 0, 1, 1, 2], [0], [0]>} : vector<8x8x32xf32>, vector<8x32x8xf32>, vector<8x8x8xf32> -> vector<8x8x8xf32>
    %c1_13 = arith.constant 1 : index
    %c0_14 = arith.constant 0 : index
    %c0_15 = arith.constant 0 : index
    %27 = vector.load %arg6[%c1_13, %c0_14, %c0_15] : memref<3x4x8xf32, #tpu.memory_space<vmem>>, vector<1x4x8xf32>
    %28 = vector.shape_cast %27 : vector<1x4x8xf32> to vector<4x8xf32>
    %29 = vector.shape_cast %28 : vector<4x8xf32> to vector<4x1x1x8xf32>
    %30 = vector.shape_cast %29 : vector<4x1x1x8xf32> to vector<4x1x1x8xf32>
    %31 = vector.broadcast %30 : vector<4x1x1x8xf32> to vector<4x2x1x8xf32>
    %32 = vector.shape_cast %31 : vector<4x2x1x8xf32> to vector<8x1x8xf32>
    %33 = vector.broadcast %32 : vector<8x1x8xf32> to vector<8x8x8xf32>
    %34 = arith.addf %26, %33 : vector<8x8x8xf32>
    %c2 = arith.constant 2 : index
    %c0_16 = arith.constant 0 : index
    %c0_17 = arith.constant 0 : index
    %c0_18 = arith.constant 0 : index
    %35 = vector.load %arg5[%c2, %c0_16, %c0_17, %c0_18] : memref<3x4x32x8xf32, #tpu.memory_space<vmem>>, vector<1x4x32x8xf32>
    %36 = vector.shape_cast %35 : vector<1x4x32x8xf32> to vector<4x32x8xf32>
    %37 = vector.shape_cast %36 : vector<4x32x8xf32> to vector<4x1x32x8xf32>
    %38 = vector.shape_cast %37 : vector<4x1x32x8xf32> to vector<4x1x32x8xf32>
    %39 = vector.broadcast %38 : vector<4x1x32x8xf32> to vector<4x2x32x8xf32>
    %40 = vector.shape_cast %39 : vector<4x2x32x8xf32> to vector<8x32x8xf32>
    %cst_19 = arith.constant dense<0.000000e+00> : vector<8x8x8xf32>
    %41 = tpu.matmul %4, %40, %cst_19 {dimension_numbers = #tpu.dot_dimension_numbers<[2], [1], [1], [2], [0, 0, 0, 1, 1, 2], [0], [0]>} : vector<8x8x32xf32>, vector<8x32x8xf32>, vector<8x8x8xf32> -> vector<8x8x8xf32>
    %c2_20 = arith.constant 2 : index
    %c0_21 = arith.constant 0 : index
    %c0_22 = arith.constant 0 : index
    %42 = vector.load %arg6[%c2_20, %c0_21, %c0_22] : memref<3x4x8xf32, #tpu.memory_space<vmem>>, vector<1x4x8xf32>
    %43 = vector.shape_cast %42 : vector<1x4x8xf32> to vector<4x8xf32>
    %44 = vector.shape_cast %43 : vector<4x8xf32> to vector<4x1x1x8xf32>
    %45 = vector.shape_cast %44 : vector<4x1x1x8xf32> to vector<4x1x1x8xf32>
    %46 = vector.broadcast %45 : vector<4x1x1x8xf32> to vector<4x2x1x8xf32>
    %47 = vector.shape_cast %46 : vector<4x2x1x8xf32> to vector<8x1x8xf32>
    %48 = vector.broadcast %47 : vector<8x1x8xf32> to vector<8x8x8xf32>
    %49 = arith.addf %41, %48 : vector<8x8x8xf32>
    %cst_23 = arith.constant 0.353553385 : f32
    %50 = vector.broadcast %cst_23 : f32 to vector<8x8x8xf32>
    %51 = arith.mulf %19, %50 : vector<8x8x8xf32>
    %c0_24 = arith.constant 0 : index
    %c0_25 = arith.constant 0 : index
    %52 = vector.load %arg4[%c0_24, %c0_25] : memref<64x8xf32, #tpu.memory_space<vmem>>, vector<64x8xf32>
    %53 = vector.shape_cast %52 : vector<64x8xf32> to vector<1x64x8xf32>
    %54 = vector.shape_cast %53 : vector<1x64x8xf32> to vector<1x64x8xf32>
    %55 = vector.broadcast %54 : vector<1x64x8xf32> to vector<8x64x8xf32>
    %cst_26 = arith.constant dense<0.000000e+00> : vector<8x64x8xf32>
    %56 = tpu.matmul %55, %34, %cst_26 {dimension_numbers = #tpu.dot_dimension_numbers<[2], [1], [1], [2], [0, 0, 0, 1, 1, 2], [0], [0]>} : vector<8x64x8xf32>, vector<8x8x8xf32>, vector<8x64x8xf32> -> vector<8x64x8xf32>
    %c0_27 = arith.constant 0 : index
    %c0_28 = arith.constant 0 : index
    %57 = vector.load %arg1[%c0_27, %c0_28] : memref<64x8xf32, #tpu.memory_space<vmem>>, vector<64x8xf32>
    %58 = vector.shape_cast %57 : vector<64x8xf32> to vector<1x64x8xf32>
    %59 = vector.shape_cast %58 : vector<1x64x8xf32> to vector<1x64x8xf32>
    %60 = vector.broadcast %59 : vector<1x64x8xf32> to vector<8x64x8xf32>
    %61 = arith.addf %56, %60 : vector<8x64x8xf32>
    %cst_29 = arith.constant dense<0.000000e+00> : vector<8x64x8xf32>
    %62 = tpu.matmul %55, %49, %cst_29 {dimension_numbers = #tpu.dot_dimension_numbers<[2], [1], [1], [2], [0, 0, 0, 1, 1, 2], [0], [0]>} : vector<8x64x8xf32>, vector<8x8x8xf32>, vector<8x64x8xf32> -> vector<8x64x8xf32>
    %c0_30 = arith.constant 0 : index
    %c0_31 = arith.constant 0 : index
    %63 = vector.load %arg2[%c0_30, %c0_31] : memref<64x8xf32, #tpu.memory_space<vmem>>, vector<64x8xf32>
    %64 = vector.shape_cast %63 : vector<64x8xf32> to vector<1x64x8xf32>
    %65 = vector.shape_cast %64 : vector<1x64x8xf32> to vector<1x64x8xf32>
    %66 = vector.broadcast %65 : vector<1x64x8xf32> to vector<8x64x8xf32>
    %67 = arith.addf %62, %66 : vector<8x64x8xf32>
    %cst_32 = arith.constant dense<0.000000e+00> : vector<8x8x64xf32>
    %68 = tpu.matmul %51, %61, %cst_32 {dimension_numbers = #tpu.dot_dimension_numbers<[2], [2], [1], [1], [0, 0, 0, 1, 1, 1], [0], [0]>} : vector<8x8x8xf32>, vector<8x64x8xf32>, vector<8x8x64xf32> -> vector<8x8x64xf32>
    %c0_33 = arith.constant 0 : index
    %c0_34 = arith.constant 0 : index
    %c0_35 = arith.constant 0 : index
    %69 = vector.load %arg3[%c0_33, %c0_34, %c0_35] : memref<8x8x64xf32, #tpu.memory_space<vmem>>, vector<8x8x64xf32>
    %70 = arith.addf %68, %69 : vector<8x8x64xf32>
    %cst_36 = arith.constant dense<0xFF800000> : vector<8x8xf32>
    %71 = vector.multi_reduction <maximumf>, %70, %cst_36 [2] : vector<8x8x64xf32> to vector<8x8xf32>
    %72 = vector.shape_cast %71 : vector<8x8xf32> to vector<8x8x1xf32>
    %73 = vector.broadcast %72 : vector<8x8x1xf32> to vector<8x8x64xf32>
    %74 = arith.subf %70, %73 : vector<8x8x64xf32>
    %75 = math.exp %74 : vector<8x8x64xf32>
    %cst_37 = arith.constant dense<0.000000e+00> : vector<8x8xf32>
    %76 = vector.multi_reduction <add>, %75, %cst_37 [2] : vector<8x8x64xf32> to vector<8x8xf32>
    %77 = vector.shape_cast %76 : vector<8x8xf32> to vector<8x8x1xf32>
    %78 = tpu.reciprocal %77 {approx = true} : vector<8x8x1xf32> -> vector<8x8x1xf32>
    %79 = vector.broadcast %78 : vector<8x8x1xf32> to vector<8x8x64xf32>
    %80 = arith.mulf %75, %79 : vector<8x8x64xf32>
    %cst_38 = arith.constant dense<0.000000e+00> : vector<8x8x8xf32>
    %81 = tpu.matmul %80, %67, %cst_38 {dimension_numbers = #tpu.dot_dimension_numbers<[2], [1], [1], [2], [0, 0, 0, 1, 1, 2], [0], [0]>} : vector<8x8x64xf32>, vector<8x64x8xf32>, vector<8x8x8xf32> -> vector<8x8x8xf32>
    %c0_39 = arith.constant 0 : index
    %c0_40 = arith.constant 0 : index
    %c0_41 = arith.constant 0 : index
    %82 = vector.load %arg7[%c0_39, %c0_40, %c0_41] : memref<4x8x32xf32, #tpu.memory_space<vmem>>, vector<4x8x32xf32>
    %83 = vector.shape_cast %82 : vector<4x8x32xf32> to vector<4x1x8x32xf32>
    %84 = vector.shape_cast %83 : vector<4x1x8x32xf32> to vector<4x1x8x32xf32>
    %85 = vector.broadcast %84 : vector<4x1x8x32xf32> to vector<4x2x8x32xf32>
    %86 = vector.shape_cast %85 : vector<4x2x8x32xf32> to vector<8x8x32xf32>
    %cst_42 = arith.constant dense<0.000000e+00> : vector<8x8x32xf32>
    %87 = tpu.matmul %81, %86, %cst_42 {dimension_numbers = #tpu.dot_dimension_numbers<[2], [1], [1], [2], [0, 0, 0, 1, 1, 2], [0], [0]>} : vector<8x8x8xf32>, vector<8x8x32xf32>, vector<8x8x32xf32> -> vector<8x8x32xf32>
    %88 = vector.shape_cast %87 : vector<8x8x32xf32> to vector<4x2x8x32xf32>
    %cst_43 = arith.constant dense<0.000000e+00> : vector<2x8x32xf32>
    %89 = vector.multi_reduction <add>, %88, %cst_43 [0] : vector<4x2x8x32xf32> to vector<2x8x32xf32>
    %c0_44 = arith.constant 0 : index
    %c0_45 = arith.constant 0 : index
    %90 = vector.load %arg10[%c0_44, %c0_45] : memref<7x64xf32, #tpu.memory_space<vmem>>, vector<1x32xf32>
    %91 = vector.shape_cast %90 : vector<1x32xf32> to vector<1x1x32xf32>
    %92 = vector.broadcast %91 : vector<1x1x32xf32> to vector<2x8x32xf32>
    %93 = arith.addf %89, %92 : vector<2x8x32xf32>
    %94 = arith.addf %0, %93 : vector<2x8x32xf32>
    %c1_46 = arith.constant 1 : index
    %c0_47 = arith.constant 0 : index
    %95 = vector.load %arg10[%c1_46, %c0_47] : memref<7x64xf32, #tpu.memory_space<vmem>>, vector<1x32xf32>
    %c2_48 = arith.constant 2 : index
    %c0_49 = arith.constant 0 : index
    %96 = vector.load %arg10[%c2_48, %c0_49] : memref<7x64xf32, #tpu.memory_space<vmem>>, vector<1x32xf32>
    %cst_50 = arith.constant dense<0.000000e+00> : vector<2x8xf32>
    %97 = vector.multi_reduction <add>, %94, %cst_50 [2] : vector<2x8x32xf32> to vector<2x8xf32>
    %98 = vector.shape_cast %97 : vector<2x8xf32> to vector<2x8x1xf32>
    %cst_51 = arith.constant 3.200000e+01 : f32
    %99 = vector.broadcast %cst_51 : f32 to vector<2x8x1xf32>
    %100 = arith.divf %98, %99 : vector<2x8x1xf32>
    %101 = vector.broadcast %100 : vector<2x8x1xf32> to vector<2x8x32xf32>
    %102 = arith.subf %94, %101 : vector<2x8x32xf32>
    %103 = arith.mulf %102, %102 : vector<2x8x32xf32>
    %cst_52 = arith.constant dense<0.000000e+00> : vector<2x8xf32>
    %104 = vector.multi_reduction <add>, %103, %cst_52 [2] : vector<2x8x32xf32> to vector<2x8xf32>
    %105 = vector.shape_cast %104 : vector<2x8xf32> to vector<2x8x1xf32>
    %cst_53 = arith.constant 3.200000e+01 : f32
    %106 = vector.broadcast %cst_53 : f32 to vector<2x8x1xf32>
    %107 = arith.divf %105, %106 : vector<2x8x1xf32>
    %108 = vector.broadcast %100 : vector<2x8x1xf32> to vector<2x8x32xf32>
    %109 = arith.subf %94, %108 : vector<2x8x32xf32>
    %cst_54 = arith.constant 1.000000e-07 : f32
    %110 = vector.broadcast %cst_54 : f32 to vector<2x8x1xf32>
    %111 = arith.addf %107, %110 : vector<2x8x1xf32>
    %112 = math.rsqrt %111 : vector<2x8x1xf32>
    %113 = vector.broadcast %112 : vector<2x8x1xf32> to vector<2x8x32xf32>
    %114 = arith.mulf %109, %113 : vector<2x8x32xf32>
    %115 = vector.shape_cast %95 : vector<1x32xf32> to vector<1x1x32xf32>
    %116 = vector.broadcast %115 : vector<1x1x32xf32> to vector<2x8x32xf32>
    %117 = arith.mulf %114, %116 : vector<2x8x32xf32>
    %118 = vector.shape_cast %96 : vector<1x32xf32> to vector<1x1x32xf32>
    %119 = vector.broadcast %118 : vector<1x1x32xf32> to vector<2x8x32xf32>
    %120 = arith.addf %117, %119 : vector<2x8x32xf32>
    %c0_55 = arith.constant 0 : index
    %c0_56 = arith.constant 0 : index
    %121 = vector.load %arg8[%c0_55, %c0_56] : memref<32x64xf32, #tpu.memory_space<vmem>>, vector<32x64xf32>
    %122 = vector.shape_cast %121 : vector<32x64xf32> to vector<1x32x64xf32>
    %123 = vector.shape_cast %122 : vector<1x32x64xf32> to vector<1x32x64xf32>
    %124 = vector.broadcast %123 : vector<1x32x64xf32> to vector<2x32x64xf32>
    %c0_57 = arith.constant 0 : index
    %c0_58 = arith.constant 0 : index
    %125 = vector.load %arg9[%c0_57, %c0_58] : memref<64x32xf32, #tpu.memory_space<vmem>>, vector<64x32xf32>
    %126 = vector.shape_cast %125 : vector<64x32xf32> to vector<1x64x32xf32>
    %127 = vector.shape_cast %126 : vector<1x64x32xf32> to vector<1x64x32xf32>
    %128 = vector.broadcast %127 : vector<1x64x32xf32> to vector<2x64x32xf32>
    %cst_59 = arith.constant dense<0.000000e+00> : vector<2x8x64xf32>
    %129 = tpu.matmul %120, %124, %cst_59 {dimension_numbers = #tpu.dot_dimension_numbers<[2], [1], [1], [2], [0, 0, 0, 1, 1, 2], [0], [0]>} : vector<2x8x32xf32>, vector<2x32x64xf32>, vector<2x8x64xf32> -> vector<2x8x64xf32>
    %c3 = arith.constant 3 : index
    %c0_60 = arith.constant 0 : index
    %130 = vector.load %arg10[%c3, %c0_60] : memref<7x64xf32, #tpu.memory_space<vmem>>, vector<1x64xf32>
    %131 = vector.shape_cast %130 : vector<1x64xf32> to vector<1x1x64xf32>
    %132 = vector.broadcast %131 : vector<1x1x64xf32> to vector<2x8x64xf32>
    %133 = arith.addf %129, %132 : vector<2x8x64xf32>
    %cst_61 = arith.constant 5.000000e-01 : f32
    %134 = vector.broadcast %cst_61 : f32 to vector<2x8x64xf32>
    %135 = arith.mulf %134, %133 : vector<2x8x64xf32>
    %cst_62 = arith.constant 0.707106769 : f32
    %136 = vector.broadcast %cst_62 : f32 to vector<2x8x64xf32>
    %137 = arith.mulf %133, %136 : vector<2x8x64xf32>
    %138 = math.absf %137 : vector<2x8x64xf32>
    %cst_63 = arith.constant 0.327591091 : f32
    %139 = vector.broadcast %cst_63 : f32 to vector<2x8x64xf32>
    %140 = arith.mulf %139, %138 : vector<2x8x64xf32>
    %cst_64 = arith.constant 1.000000e+00 : f32
    %141 = vector.broadcast %cst_64 : f32 to vector<2x8x64xf32>
    %142 = arith.addf %141, %140 : vector<2x8x64xf32>
    %cst_65 = arith.constant 1.000000e+00 : f32
    %143 = vector.broadcast %cst_65 : f32 to vector<2x8x64xf32>
    %144 = arith.divf %143, %142 : vector<2x8x64xf32>
    %cst_66 = arith.constant 1.06140542 : f32
    %145 = vector.broadcast %cst_66 : f32 to vector<2x8x64xf32>
    %146 = arith.mulf %145, %144 : vector<2x8x64xf32>
    %cst_67 = arith.constant -1.45315206 : f32
    %147 = vector.broadcast %cst_67 : f32 to vector<2x8x64xf32>
    %148 = arith.addf %146, %147 : vector<2x8x64xf32>
    %149 = arith.mulf %148, %144 : vector<2x8x64xf32>
    %cst_68 = arith.constant 1.42141378 : f32
    %150 = vector.broadcast %cst_68 : f32 to vector<2x8x64xf32>
    %151 = arith.addf %149, %150 : vector<2x8x64xf32>
    %152 = arith.mulf %151, %144 : vector<2x8x64xf32>
    %cst_69 = arith.constant -0.284496725 : f32
    %153 = vector.broadcast %cst_69 : f32 to vector<2x8x64xf32>
    %154 = arith.addf %152, %153 : vector<2x8x64xf32>
    %155 = arith.mulf %154, %144 : vector<2x8x64xf32>
    %cst_70 = arith.constant 0.254829586 : f32
    %156 = vector.broadcast %cst_70 : f32 to vector<2x8x64xf32>
    %157 = arith.addf %155, %156 : vector<2x8x64xf32>
    %158 = arith.mulf %157, %144 : vector<2x8x64xf32>
    %cst_71 = arith.constant 0.000000e+00 : f32
    %159 = vector.broadcast %cst_71 : f32 to vector<2x8x64xf32>
    %160 = arith.subf %159, %138 : vector<2x8x64xf32>
    %161 = arith.mulf %160, %138 : vector<2x8x64xf32>
    %162 = math.exp %161 : vector<2x8x64xf32>
    %163 = arith.mulf %158, %162 : vector<2x8x64xf32>
    %cst_72 = arith.constant 1.000000e+00 : f32
    %164 = vector.broadcast %cst_72 : f32 to vector<2x8x64xf32>
    %165 = arith.subf %164, %163 : vector<2x8x64xf32>
    %cst_73 = arith.constant 0.000000e+00 : f32
    %166 = vector.broadcast %cst_73 : f32 to vector<2x8x64xf32>
    %167 = arith.cmpf oge, %137, %166 : vector<2x8x64xf32>
    %cst_74 = arith.constant 0.000000e+00 : f32
    %168 = vector.broadcast %cst_74 : f32 to vector<2x8x64xf32>
    %169 = arith.subf %168, %165 : vector<2x8x64xf32>
    %170 = arith.select %167, %165, %169 : vector<2x8x64xi1>, vector<2x8x64xf32>
    %cst_75 = arith.constant 1.000000e+00 : f32
    %171 = vector.broadcast %cst_75 : f32 to vector<2x8x64xf32>
    %172 = arith.addf %171, %170 : vector<2x8x64xf32>
    %173 = arith.mulf %135, %172 : vector<2x8x64xf32>
    %cst_76 = arith.constant dense<0.000000e+00> : vector<2x8x32xf32>
    %174 = tpu.matmul %173, %128, %cst_76 {dimension_numbers = #tpu.dot_dimension_numbers<[2], [1], [1], [2], [0, 0, 0, 1, 1, 2], [0], [0]>} : vector<2x8x64xf32>, vector<2x64x32xf32>, vector<2x8x32xf32> -> vector<2x8x32xf32>
    %c4 = arith.constant 4 : index
    %c0_77 = arith.constant 0 : index
    %175 = vector.load %arg10[%c4, %c0_77] : memref<7x64xf32, #tpu.memory_space<vmem>>, vector<1x32xf32>
    %176 = vector.shape_cast %175 : vector<1x32xf32> to vector<1x1x32xf32>
    %177 = vector.broadcast %176 : vector<1x1x32xf32> to vector<2x8x32xf32>
    %178 = arith.addf %174, %177 : vector<2x8x32xf32>
    %179 = arith.addf %120, %178 : vector<2x8x32xf32>
    %c5 = arith.constant 5 : index
    %c0_78 = arith.constant 0 : index
    %180 = vector.load %arg10[%c5, %c0_78] : memref<7x64xf32, #tpu.memory_space<vmem>>, vector<1x32xf32>
    %c6 = arith.constant 6 : index
    %c0_79 = arith.constant 0 : index
    %181 = vector.load %arg10[%c6, %c0_79] : memref<7x64xf32, #tpu.memory_space<vmem>>, vector<1x32xf32>
    %cst_80 = arith.constant dense<0.000000e+00> : vector<2x8xf32>
    %182 = vector.multi_reduction <add>, %179, %cst_80 [2] : vector<2x8x32xf32> to vector<2x8xf32>
    %183 = vector.shape_cast %182 : vector<2x8xf32> to vector<2x8x1xf32>
    %cst_81 = arith.constant 3.200000e+01 : f32
    %184 = vector.broadcast %cst_81 : f32 to vector<2x8x1xf32>
    %185 = arith.divf %183, %184 : vector<2x8x1xf32>
    %186 = vector.broadcast %185 : vector<2x8x1xf32> to vector<2x8x32xf32>
    %187 = arith.subf %179, %186 : vector<2x8x32xf32>
    %188 = arith.mulf %187, %187 : vector<2x8x32xf32>
    %cst_82 = arith.constant dense<0.000000e+00> : vector<2x8xf32>
    %189 = vector.multi_reduction <add>, %188, %cst_82 [2] : vector<2x8x32xf32> to vector<2x8xf32>
    %190 = vector.shape_cast %189 : vector<2x8xf32> to vector<2x8x1xf32>
    %cst_83 = arith.constant 3.200000e+01 : f32
    %191 = vector.broadcast %cst_83 : f32 to vector<2x8x1xf32>
    %192 = arith.divf %190, %191 : vector<2x8x1xf32>
    %193 = vector.broadcast %185 : vector<2x8x1xf32> to vector<2x8x32xf32>
    %194 = arith.subf %179, %193 : vector<2x8x32xf32>
    %cst_84 = arith.constant 1.000000e-07 : f32
    %195 = vector.broadcast %cst_84 : f32 to vector<2x8x1xf32>
    %196 = arith.addf %192, %195 : vector<2x8x1xf32>
    %197 = math.rsqrt %196 : vector<2x8x1xf32>
    %198 = vector.broadcast %197 : vector<2x8x1xf32> to vector<2x8x32xf32>
    %199 = arith.mulf %194, %198 : vector<2x8x32xf32>
    %200 = vector.shape_cast %180 : vector<1x32xf32> to vector<1x1x32xf32>
    %201 = vector.broadcast %200 : vector<1x1x32xf32> to vector<2x8x32xf32>
    %202 = arith.mulf %199, %201 : vector<2x8x32xf32>
    %203 = vector.shape_cast %181 : vector<1x32xf32> to vector<1x1x32xf32>
    %204 = vector.broadcast %203 : vector<1x1x32xf32> to vector<2x8x32xf32>
    %205 = arith.addf %202, %204 : vector<2x8x32xf32>
    %c0_85 = arith.constant 0 : index
    %c0_86 = arith.constant 0 : index
    %c0_87 = arith.constant 0 : index
    %206 = vector.load %arg11[%c0_85, %c0_86, %c0_87] : memref<2x8x32xf32, #tpu.memory_space<vmem>>, vector<2x8x32xf32>
    tpu.vector_store %arg11[%c0_85, %c0_86, %c0_87], %205 {strides = array<i32>} : memref<2x8x32xf32, #tpu.memory_space<vmem>>, vector<2x8x32xf32>,
    return
  }
}

</mosaic_0001>

<bundles_post_ra>
// kernel: tpu_custom_call.1
= control target key start
LH: loop header
LB: loop body
LE: loop exit
PB: predicated region body
PF: predicated region fallthrough
CT: control target
= control target key end

     0   :  { %v9728_v1 = vmov 0.0   ;;  %vm103_vm0 = vcmask 261120   ;;  %vm7903_vm1 = vmmov 0   ;;  %s9716_s0 = inlined_call_operand.vmem [shape: f32[2,8,32], index: 0, kind: input, shape index: {}]   ;;  %s9717_s1 = inlined_call_operand.vmem [shape: f32[64,8], index: 1, kind: input, shape index: {}]   ;;  %s9718_s2 = inlined_call_operand.vmem [shape: f32[64,8], index: 2, kind: input, shape index: {}]   ;;  %s9719_s3 = inlined_call_operand.vmem [shape: f32[8,8,64], index: 3, kind: input, shape index: {}]   ;;  %s9720_s4 = inlined_call_operand.vmem [shape: f32[64,8], index: 4, kind: input, shape index: {}]   ;;  %s9721_s5 = inlined_call_operand.vmem [shape: f32[3,4,32,8], index: 5, kind: input, shape index: {}]   ;;  %s9722_s6 = inlined_call_operand.vmem [shape: f32[3,4,8], index: 6, kind: input, shape index: {}]   ;;  %s9723_s7 = inlined_call_operand.vmem [shape: f32[4,8,32], index: 7, kind: input, shape index: {}]   ;;  %s9724_s8 = inlined_call_operand.vmem [shape: f32[32,64], index: 8, kind: input, shape index: {}]   ;;  %s9725_s9 = inlined_call_operand.vmem [shape: f32[64,32], index: 9, kind: input, shape index: {}]   ;;  %s9726_s10 = inlined_call_operand.vmem [shape: f32[7,64], index: 10, kind: input, shape index: {}]   ;;  %s9727_s11 = inlined_call_operand.hbm [shape: f32[2,8,32], index: 11, kind: output, shape index: {}]  }
   0x1   :  { %v44_v0 = vld [vmem:[%s9721_s5 + $0x18] sm:$0xff]  ;;  %6932 = vmatprep.subr.mxu0 %v9728_v1  ;;  %6943 = vmatprep.subr.mxu1 %v9728_v1  ;;  %v43_v2 = vld [vmem:[%s9721_s5 + $0x10] sm:$0xff]  ;;  %v42_v3 = vld [vmem:[%s9721_s5 + $0x8] sm:$0xff] }
   0x2   :  { %6933 = vmatpush3.msra.mxu0 %v44_v0  ;;  %6944 = vmatpush3.msra.mxu1 %v44_v0  ;;  %v41_v4 = vld [vmem:[%s9721_s5] sm:$0xff]  ;;  %v7996_v6 = vld [vmem:[%s9716_s0 + $0x8] sm:$0xff]  ;;  %v48_v7 = vld [vmem:[%s9721_s5 + $0x38] sm:$0xff] }
   0x3   :  { %6934 = vmatprep.subr.mxu0 %v9728_v1  ;;  %6945 = vmatprep.subr.mxu1 %v9728_v1  ;;  %v7991_v5 = vld [vmem:[%s9716_s0] sm:$0xff]  ;;  %v47_v8 = vld [vmem:[%s9721_s5 + $0x30] sm:$0xff]  ;;  %v46_v9 = vld [vmem:[%s9721_s5 + $0x28] sm:$0xff] }
   0x4   :  { %6935 = vmatpush3.msra.mxu0 %v43_v2  ;;  %6946 = vmatpush3.msra.mxu1 %v43_v2 }
   0x5   :  { %6936 = vmatprep.subr.mxu0 %v9728_v1  ;;  %6947 = vmatprep.subr.mxu1 %v9728_v1 }
   0x6   :  { %6937 = vmatpush3.msra.mxu0 %v42_v3  ;;  %6948 = vmatpush3.msra.mxu1 %v42_v3 }
   0x7   :  { %6938 = vmatprep.subr.mxu0 %v9728_v1  ;;  %6949 = vmatprep.subr.mxu1 %v9728_v1 }
   0x8   :  { %6939 = vmatpush3.msra.mxu0 %v41_v4  ;;  %6940 = vmatprep.mubr.msk.f32.mxu0 %vm7903_vm1, %v9728_v1 }
   0x9   :  { %6950 = vmatpush3.msra.mxu1 %v41_v4  ;;  %6951 = vmatprep.mubr.msk.f32.mxu1 %vm7903_vm1, %v9728_v1 }
   0xa   :  { %6941 = vmatmul.mubr.msk.f32.vlgmr.msra.gmra.mxu0 %vm103_vm0, %v7991_v5  ;;  %6952 = vmatmul.mubr.msk.f32.vlgmr.msra.gmra.mxu1 %vm103_vm0, %v7996_v6 }
   0xb   :  { %6954 = vmatprep.subr.mxu0 %v9728_v1  ;;  %6965 = vmatprep.subr.mxu1 %v9728_v1 }
   0xc   :  { %6955 = vmatpush3.msra.mxu0 %v48_v7  ;;  %6966 = vmatpush3.msra.mxu1 %v48_v7 }
   0xd   :  { %6956 = vmatprep.subr.mxu0 %v9728_v1  ;;  %6967 = vmatprep.subr.mxu1 %v9728_v1 }
   0xe   :  { %6957 = vmatpush3.msra.mxu0 %v47_v8  ;;  %6968 = vmatpush3.msra.mxu1 %v47_v8 }
   0xf   :  { %16 = vsyncpa [#allocation3], 0  ;;  %6958 = vmatprep.subr.mxu0 %v9728_v1  ;;  %6969 = vmatprep.subr.mxu1 %v9728_v1  ;;  %v45_v10 = vld [vmem:[%s9721_s5 + $0x20] sm:$0xff]  ;;  %v52_v11 = vld [vmem:[%s9721_s5 + $0x58] sm:$0xff]  ;;  %vm1942_vm2 = vcmask 64512   ;;  %v70_v3 = vlaneseq  ;;  %vm4439_vm3 = vcmask 523264  }
  0x10   :  { %6959 = vmatpush3.msra.mxu0 %v46_v9  ;;  %6970 = vmatpush3.msra.mxu1 %v46_v9  ;;  %v51_v12 = vld [vmem:[%s9721_s5 + $0x50] sm:$0xff]  ;;  %v50_v13 = vld [vmem:[%s9721_s5 + $0x48] sm:$0xff]  ;;  %v49_v14 = vld [vmem:[%s9721_s5 + $0x40] sm:$0xff]  ;;  %v7904_v0 = vmov 1966171168   ;;  %s7905_s19 = smov [#allocation2]  }
  0x11   :  { %6960 = vmatprep.subr.mxu0 %v9728_v1  ;;  %6971 = vmatprep.subr.mxu1 %v9728_v1  ;;  %v56_v15 = vld [vmem:[%s9721_s5 + $0x78] sm:$0xff]  ;;  %v55_v16 = vld [vmem:[%s9721_s5 + $0x70] sm:$0xff]  ;;  %v54_v17 = vld [vmem:[%s9721_s5 + $0x68] sm:$0xff]  ;;  %v68_v2 = vunpack.c.l.s4 %v7904_v0 }
  0x12   :  { %6961 = vmatpush3.msra.mxu0 %v45_v10  ;;  %6962 = vmatprep.mubr.msk.f32.mxu0 %vm7903_vm1, %v9728_v1  ;;  %v53_v18 = vld [vmem:[%s9721_s5 + $0x60] sm:$0xff]  ;;  %v6204_v19 = vld [vmem:[%s9721_s5 + $0x98] sm:$0xff]  ;;  %v6203_v20 = vld [vmem:[%s9721_s5 + $0x90] sm:$0xff] }
  0x13   :  { %6972 = vmatpush3.msra.mxu1 %v45_v10  ;;  %6973 = vmatprep.mubr.msk.f32.mxu1 %vm7903_vm1, %v9728_v1  ;;  %v6202_v21 = vld [vmem:[%s9721_s5 + $0x88] sm:$0xff]  ;;  %v6201_v22 = vld [vmem:[%s9721_s5 + $0x80] sm:$0xff]  ;;  %v6208_v23 = vld [vmem:[%s9721_s5 + $0xb8] sm:$0xff]  ;;  %v69_v4 = vunpack.c.0.s8 %v68_v2 }
  0x14   :  { %6963 = vmatmul.mubr.msk.f32.vlgmr.msra.gmra.mxu0 %vm103_vm0, %v7991_v5  ;;  %6974 = vmatmul.mubr.msk.f32.vlgmr.msra.gmra.mxu1 %vm103_vm0, %v7996_v6  ;;  %v6207_v24 = vld [vmem:[%s9721_s5 + $0xb0] sm:$0xff]  ;;  %v6206_v25 = vld [vmem:[%s9721_s5 + $0xa8] sm:$0xff]  ;;  %v6205_v26 = vld [vmem:[%s9721_s5 + $0xa0] sm:$0xff] }
  0x15   :  { %6976 = vmatprep.subr.mxu0 %v9728_v1  ;;  %6987 = vmatprep.subr.mxu1 %v9728_v1  ;;  %v6212_v27 = vld [vmem:[%s9721_s5 + $0xd8] sm:$0xff]  ;;  %v6211_v28 = vld [vmem:[%s9721_s5 + $0xd0] sm:$0xff]  ;;  %v6210_v29 = vld [vmem:[%s9721_s5 + $0xc8] sm:$0xff] }
  0x16   :  { %6977 = vmatpush3.msra.mxu0 %v52_v11  ;;  %6988 = vmatpush3.msra.mxu1 %v52_v11  ;;  %v6209_v30 = vld [vmem:[%s9721_s5 + $0xc0] sm:$0xff]  ;;  %v6216_v31 = vld [vmem:[%s9721_s5 + $0xf8] sm:$0xff]  ;;  %v6215_v32 = vld [vmem:[%s9721_s5 + $0xf0] sm:$0xff] }
  0x17   :  { %6978 = vmatprep.subr.mxu0 %v9728_v1  ;;  %6989 = vmatprep.subr.mxu1 %v9728_v1  ;;  %v6214_v33 = vld [vmem:[%s9721_s5 + $0xe8] sm:$0xff]  ;;  %v6213_v34 = vld [vmem:[%s9721_s5 + $0xe0] sm:$0xff]  ;;  %v6230_v35 = vld [vmem:[%s9721_s5 + $0x118] sm:$0xff] }
  0x18   :  { %6979 = vmatpush3.msra.mxu0 %v51_v12  ;;  %6990 = vmatpush3.msra.mxu1 %v51_v12  ;;  %v6229_v36 = vld [vmem:[%s9721_s5 + $0x110] sm:$0xff]  ;;  %v6228_v37 = vld [vmem:[%s9721_s5 + $0x108] sm:$0xff]  ;;  %v6227_v38 = vld [vmem:[%s9721_s5 + $0x100] sm:$0xff] }
  0x19   :  { %6980 = vmatprep.subr.mxu0 %v9728_v1  ;;  %6991 = vmatprep.subr.mxu1 %v9728_v1  ;;  %v6234_v39 = vld [vmem:[%s9721_s5 + $0x138] sm:$0xff]  ;;  %v6233_v40 = vld [vmem:[%s9721_s5 + $0x130] sm:$0xff]  ;;  %v6232_v41 = vld [vmem:[%s9721_s5 + $0x128] sm:$0xff] }
  0x1a   :  { %6981 = vmatpush3.msra.mxu0 %v50_v13  ;;  %6992 = vmatpush3.msra.mxu1 %v50_v13  ;;  %v6231_v42 = vld [vmem:[%s9721_s5 + $0x120] sm:$0xff]  ;;  %v6238_v43 = vld [vmem:[%s9721_s5 + $0x158] sm:$0xff]  ;;  %v6237_v44 = vld [vmem:[%s9721_s5 + $0x150] sm:$0xff] }
  0x1b   :  { %6982 = vmatprep.subr.mxu0 %v9728_v1  ;;  %6993 = vmatprep.subr.mxu1 %v9728_v1  ;;  %v6236_v45 = vld [vmem:[%s9721_s5 + $0x148] sm:$0xff]  ;;  %v6235_v46 = vld [vmem:[%s9721_s5 + $0x140] sm:$0xff]  ;;  %v6242_v47 = vld [vmem:[%s9721_s5 + $0x178] sm:$0xff] }
  0x1c   :  { %6983 = vmatpush3.msra.mxu0 %v49_v14  ;;  %6984 = vmatprep.mubr.msk.f32.mxu0 %vm7903_vm1, %v9728_v1  ;;  %v6241_v48 = vld [vmem:[%s9721_s5 + $0x170] sm:$0xff]  ;;  %v6240_v49 = vld [vmem:[%s9721_s5 + $0x168] sm:$0xff]  ;;  %v6239_v50 = vld [vmem:[%s9721_s5 + $0x160] sm:$0xff] }
  0x1d   :  { %6994 = vmatpush3.msra.mxu1 %v49_v14  ;;  %6995 = vmatprep.mubr.msk.f32.mxu1 %vm7903_vm1, %v9728_v1  ;;  %v8311_v51 = vld [vmem:[%s9720_s4] sm:$0xff] }
  0x1e   :  { %6985 = vmatmul.mubr.msk.f32.vlgmr.msra.gmra.mxu0 %vm103_vm0, %v7991_v5  ;;  %6996 = vmatmul.mubr.msk.f32.vlgmr.msra.gmra.mxu1 %vm103_vm0, %v7996_v6  ;;  %v6218_v8 = vld.sshfl [vmem:[%s9722_s6 + $0x4] sm:$0x33 pattern:$0x75316420] }
  0x1f   :  { %6998 = vmatprep.subr.mxu0 %v9728_v1  ;;  %7009 = vmatprep.subr.mxu1 %v9728_v1 }
  0x20   :  { %6999 = vmatpush3.msra.mxu0 %v56_v15  ;;  %7010 = vmatpush3.msra.mxu1 %v56_v15  ;;  %v697_v15 = vcombine.high %v6218_v8, %v6218_v8 }
  0x21   :  { %7000 = vmatprep.subr.mxu0 %v9728_v1  ;;  %7011 = vmatprep.subr.mxu1 %v9728_v1 }
  0x22   :  { %7001 = vmatpush3.msra.mxu0 %v55_v16  ;;  %7012 = vmatpush3.msra.mxu1 %v55_v16 }
  0x23   :  { %7002 = vmatprep.subr.mxu0 %v9728_v1  ;;  %7013 = vmatprep.subr.mxu1 %v9728_v1 }
  0x24   :  { %7003 = vmatpush3.msra.mxu0 %v54_v17  ;;  %7014 = vmatpush3.msra.mxu1 %v54_v17 }
  0x25   :  { %7004 = vmatprep.subr.mxu0 %v9728_v1  ;;  %7015 = vmatprep.subr.mxu1 %v9728_v1 }
  0x26   :  { %7005 = vmatpush3.msra.mxu0 %v53_v18  ;;  %7006 = vmatprep.mubr.msk.f32.mxu0 %vm7903_vm1, %v9728_v1 }
  0x27   :  { %7016 = vmatpush3.msra.mxu1 %v53_v18  ;;  %7017 = vmatprep.mubr.msk.f32.mxu1 %vm7903_vm1, %v9728_v1 }
  0x28   :  { %7007 = vmatmul.mubr.msk.f32.vlgmr.msra.gmra.mxu0 %vm103_vm0, %v7991_v5  ;;  %7018 = vmatmul.mubr.msk.f32.vlgmr.msra.gmra.mxu1 %vm103_vm0, %v7996_v6 }
  0x29   :  { %7020 = vmatprep.subr.mxu0 %v9728_v1  ;;  %7031 = vmatprep.subr.mxu1 %v9728_v1 }
  0x2a   :  { %7021 = vmatpush3.msra.mxu0 %v6204_v19  ;;  %7032 = vmatpush3.msra.mxu1 %v6204_v19 }
  0x2b   :  { %7022 = vmatprep.subr.mxu0 %v9728_v1  ;;  %7033 = vmatprep.subr.mxu1 %v9728_v1 }
  0x2c   :  { %7023 = vmatpush3.msra.mxu0 %v6203_v20  ;;  %7034 = vmatpush3.msra.mxu1 %v6203_v20 }
  0x2d   :  { %7024 = vmatprep.subr.mxu0 %v9728_v1  ;;  %7035 = vmatprep.subr.mxu1 %v9728_v1 }
  0x2e   :  { %7025 = vmatpush3.msra.mxu0 %v6202_v21  ;;  %7036 = vmatpush3.msra.mxu1 %v6202_v21 }
  0x2f   :  { %7026 = vmatprep.subr.mxu0 %v9728_v1  ;;  %7037 = vmatprep.subr.mxu1 %v9728_v1 }
  0x30   :  { %7027 = vmatpush3.msra.mxu0 %v6201_v22  ;;  %7028 = vmatprep.mubr.msk.f32.mxu0 %vm7903_vm1, %v9728_v1 }
  0x31   :  { %7038 = vmatpush3.msra.mxu1 %v6201_v22  ;;  %7039 = vmatprep.mubr.msk.f32.mxu1 %vm7903_vm1, %v9728_v1  ;;  %v8351_v22 = vld [vmem:[%s9720_s4 + $0x8] sm:$0xff] }
  0x32   :  { %7029 = vmatmul.mubr.msk.f32.vlgmr.msra.gmra.mxu0 %vm103_vm0, %v7991_v5  ;;  %7040 = vmatmul.mubr.msk.f32.vlgmr.msra.gmra.mxu1 %vm103_vm0, %v7996_v6 }
  0x33   :  { %7042 = vmatprep.subr.mxu0 %v9728_v1  ;;  %7053 = vmatprep.subr.mxu1 %v9728_v1 }
  0x34   :  { %7043 = vmatpush3.msra.mxu0 %v6208_v23  ;;  %7054 = vmatpush3.msra.mxu1 %v6208_v23  ;;  %v8356_v23 = vld [vmem:[%s9720_s4 + $0x10] sm:$0xff] }
  0x35   :  { %7044 = vmatprep.subr.mxu0 %v9728_v1  ;;  %7055 = vmatprep.subr.mxu1 %v9728_v1 }
  0x36   :  { %7045 = vmatpush3.msra.mxu0 %v6207_v24  ;;  %7056 = vmatpush3.msra.mxu1 %v6207_v24 }
  0x37   :  { %7046 = vmatprep.subr.mxu0 %v9728_v1  ;;  %7057 = vmatprep.subr.mxu1 %v9728_v1 }
  0x38   :  { %7047 = vmatpush3.msra.mxu0 %v6206_v25  ;;  %7058 = vmatpush3.msra.mxu1 %v6206_v25  ;;  %v8370_v25 = vld [vmem:[%s9720_s4 + $0x18] sm:$0xff] }
  0x39   :  { %7048 = vmatprep.subr.mxu0 %v9728_v1  ;;  %7059 = vmatprep.subr.mxu1 %v9728_v1 }
  0x3a   :  { %7049 = vmatpush3.msra.mxu0 %v6205_v26  ;;  %7050 = vmatprep.mubr.msk.f32.mxu0 %vm7903_vm1, %v9728_v1 }
  0x3b   :  { %7060 = vmatpush3.msra.mxu1 %v6205_v26  ;;  %7061 = vmatprep.mubr.msk.f32.mxu1 %vm7903_vm1, %v9728_v1  ;;  %v8375_v26 = vld [vmem:[%s9720_s4 + $0x20] sm:$0xff] }
  0x3c   :  { %7051 = vmatmul.mubr.msk.f32.vlgmr.msra.gmra.mxu0 %vm103_vm0, %v7991_v5  ;;  %7062 = vmatmul.mubr.msk.f32.vlgmr.msra.gmra.mxu1 %vm103_vm0, %v7996_v6 }
  0x3d   :  { %7064 = vmatprep.subr.mxu0 %v9728_v1  ;;  %7075 = vmatprep.subr.mxu1 %v9728_v1 }
  0x3e   :  { %7065 = vmatpush3.msra.mxu0 %v6212_v27  ;;  %7076 = vmatpush3.msra.mxu1 %v6212_v27 }
  0x3f   :  { %7066 = vmatprep.subr.mxu0 %v9728_v1  ;;  %7077 = vmatprep.subr.mxu1 %v9728_v1 }
  0x40   :  { %7067 = vmatpush3.msra.mxu0 %v6211_v28  ;;  %7078 = vmatpush3.msra.mxu1 %v6211_v28  ;;  %v8389_v28 = vld [vmem:[%s9720_s4 + $0x28] sm:$0xff] }
  0x41   :  { %7068 = vmatprep.subr.mxu0 %v9728_v1  ;;  %7079 = vmatprep.subr.mxu1 %v9728_v1 }
  0x42   :  { %7069 = vmatpush3.msra.mxu0 %v6210_v29  ;;  %7080 = vmatpush3.msra.mxu1 %v6210_v29 }
  0x43   :  { %7070 = vmatprep.subr.mxu0 %v9728_v1  ;;  %7081 = vmatprep.subr.mxu1 %v9728_v1 }
  0x44   :  { %7071 = vmatpush3.msra.mxu0 %v6209_v30  ;;  %7072 = vmatprep.mubr.msk.f32.mxu0 %vm7903_vm1, %v9728_v1 }
  0x45   :  { %7082 = vmatpush3.msra.mxu1 %v6209_v30  ;;  %7083 = vmatprep.mubr.msk.f32.mxu1 %vm7903_vm1, %v9728_v1 }
  0x46   :  { %7073 = vmatmul.mubr.msk.f32.vlgmr.msra.gmra.mxu0 %vm103_vm0, %v7991_v5  ;;  %7084 = vmatmul.mubr.msk.f32.vlgmr.msra.gmra.mxu1 %vm103_vm0, %v7996_v6 }
  0x47   :  { %7086 = vmatprep.subr.mxu0 %v9728_v1  ;;  %7097 = vmatprep.subr.mxu1 %v9728_v1 }
  0x48   :  { %7087 = vmatpush3.msra.mxu0 %v6216_v31  ;;  %7098 = vmatpush3.msra.mxu1 %v6216_v31  ;;  %v8394_v31 = vld [vmem:[%s9720_s4 + $0x30] sm:$0xff] }
  0x49   :  { %7088 = vmatprep.subr.mxu0 %v9728_v1  ;;  %7099 = vmatprep.subr.mxu1 %v9728_v1 }
  0x4a   :  { %7089 = vmatpush3.msra.mxu0 %v6215_v32  ;;  %7100 = vmatpush3.msra.mxu1 %v6215_v32 }
  0x4b   :  { %7090 = vmatprep.subr.mxu0 %v9728_v1  ;;  %7101 = vmatprep.subr.mxu1 %v9728_v1 }
  0x4c   :  { %7091 = vmatpush3.msra.mxu0 %v6214_v33  ;;  %7102 = vmatpush3.msra.mxu1 %v6214_v33 }
  0x4d   :  { %7092 = vmatprep.subr.mxu0 %v9728_v1  ;;  %7103 = vmatprep.subr.mxu1 %v9728_v1 }
  0x4e   :  { %7093 = vmatpush3.msra.mxu0 %v6213_v34  ;;  %7094 = vmatprep.mubr.msk.f32.mxu0 %vm7903_vm1, %v9728_v1 }
  0x4f   :  { %7104 = vmatpush3.msra.mxu1 %v6213_v34  ;;  %7105 = vmatprep.mubr.msk.f32.mxu1 %vm7903_vm1, %v9728_v1 }
  0x50   :  { %7095 = vmatmul.mubr.msk.f32.vlgmr.msra.gmra.mxu0 %vm103_vm0, %v7991_v5  ;;  %7106 = vmatmul.mubr.msk.f32.vlgmr.msra.gmra.mxu1 %vm103_vm0, %v7996_v6 }
  0x51   :  { %7108 = vmatprep.subr.mxu0 %v9728_v1  ;;  %7119 = vmatprep.subr.mxu1 %v9728_v1 }
  0x52   :  { %7109 = vmatpush3.msra.mxu0 %v6230_v35  ;;  %7120 = vmatpush3.msra.mxu1 %v6230_v35 }
  0x53   :  { %7110 = vmatprep.subr.mxu0 %v9728_v1  ;;  %7121 = vmatprep.subr.mxu1 %v9728_v1 }
  0x54   :  { %7111 = vmatpush3.msra.mxu0 %v6229_v36  ;;  %7122 = vmatpush3.msra.mxu1 %v6229_v36 }
  0x55   :  { %7112 = vmatprep.subr.mxu0 %v9728_v1  ;;  %7123 = vmatprep.subr.mxu1 %v9728_v1 }
  0x56   :  { %7113 = vmatpush3.msra.mxu0 %v6228_v37  ;;  %7124 = vmatpush3.msra.mxu1 %v6228_v37  ;;  %v8407_v37 = vld [vmem:[%s9720_s4 + $0x38] sm:$0xff] }
  0x57   :  { %7114 = vmatprep.subr.mxu0 %v9728_v1  ;;  %7125 = vmatprep.subr.mxu1 %v9728_v1 }
  0x58   :  { %7115 = vmatpush3.msra.mxu0 %v6227_v38  ;;  %7116 = vmatprep.mubr.msk.f32.mxu0 %vm7903_vm1, %v9728_v1 }
  0x59   :  { %7126 = vmatpush3.msra.mxu1 %v6227_v38  ;;  %7127 = vmatprep.mubr.msk.f32.mxu1 %vm7903_vm1, %v9728_v1 }
  0x5a   :  { %7117 = vmatmul.mubr.msk.f32.vlgmr.msra.gmra.mxu0 %vm103_vm0, %v7991_v5  ;;  %7128 = vmatmul.mubr.msk.f32.vlgmr.msra.gmra.mxu1 %vm103_vm0, %v7996_v6 }
  0x5b   :  { %7130 = vmatprep.subr.mxu0 %v9728_v1  ;;  %7141 = vmatprep.subr.mxu1 %v9728_v1 }
  0x5c   :  { %7131 = vmatpush3.msra.mxu0 %v6234_v39  ;;  %7142 = vmatpush3.msra.mxu1 %v6234_v39 }
  0x5d   :  { %7132 = vmatprep.subr.mxu0 %v9728_v1  ;;  %7143 = vmatprep.subr.mxu1 %v9728_v1 }
  0x5e   :  { %7133 = vmatpush3.msra.mxu0 %v6233_v40  ;;  %7144 = vmatpush3.msra.mxu1 %v6233_v40 }
  0x5f   :  { %7134 = vmatprep.subr.mxu0 %v9728_v1  ;;  %7145 = vmatprep.subr.mxu1 %v9728_v1 }
  0x60   :  { %7135 = vmatpush3.msra.mxu0 %v6232_v41  ;;  %7146 = vmatpush3.msra.mxu1 %v6232_v41 }
  0x61   :  { %7136 = vmatprep.subr.mxu0 %v9728_v1  ;;  %7147 = vmatprep.subr.mxu1 %v9728_v1 }
  0x62   :  { %7137 = vmatpush3.msra.mxu0 %v6231_v42  ;;  %7138 = vmatprep.mubr.msk.f32.mxu0 %vm7903_vm1, %v9728_v1 }
  0x63   :  { %7148 = vmatpush3.msra.mxu1 %v6231_v42  ;;  %7149 = vmatprep.mubr.msk.f32.mxu1 %vm7903_vm1, %v9728_v1 }
  0x64   :  { %7139 = vmatmul.mubr.msk.f32.vlgmr.msra.gmra.mxu0 %vm103_vm0, %v7991_v5  ;;  %7150 = vmatmul.mubr.msk.f32.vlgmr.msra.gmra.mxu1 %vm103_vm0, %v7996_v6 }
  0x65   :  { %7152 = vmatprep.subr.mxu0 %v9728_v1  ;;  %7163 = vmatprep.subr.mxu1 %v9728_v1 }
  0x66   :  { %7153 = vmatpush3.msra.mxu0 %v6238_v43  ;;  %7164 = vmatpush3.msra.mxu1 %v6238_v43 }
  0x67   :  { %7154 = vmatprep.subr.mxu0 %v9728_v1  ;;  %7165 = vmatprep.subr.mxu1 %v9728_v1 }
  0x68   :  { %7155 = vmatpush3.msra.mxu0 %v6237_v44  ;;  %7166 = vmatpush3.msra.mxu1 %v6237_v44 }
  0x69   :  { %7156 = vmatprep.subr.mxu0 %v9728_v1  ;;  %7167 = vmatprep.subr.mxu1 %v9728_v1 }
  0x6a   :  { %7157 = vmatpush3.msra.mxu0 %v6236_v45  ;;  %7168 = vmatpush3.msra.mxu1 %v6236_v45 }
  0x6b   :  { %7158 = vmatprep.subr.mxu0 %v9728_v1  ;;  %7169 = vmatprep.subr.mxu1 %v9728_v1 }
  0x6c   :  { %7159 = vmatpush3.msra.mxu0 %v6235_v46  ;;  %7160 = vmatprep.mubr.msk.f32.mxu0 %vm7903_vm1, %v9728_v1 }
  0x6d   :  { %7170 = vmatpush3.msra.mxu1 %v6235_v46  ;;  %7171 = vmatprep.mubr.msk.f32.mxu1 %vm7903_vm1, %v9728_v1 }
  0x6e   :  { %7161 = vmatmul.mubr.msk.f32.vlgmr.msra.gmra.mxu0 %vm103_vm0, %v7991_v5  ;;  %7172 = vmatmul.mubr.msk.f32.vlgmr.msra.gmra.mxu1 %vm103_vm0, %v7996_v6 }
  0x6f   :  { %7174 = vmatprep.subr.mxu0 %v9728_v1  ;;  %7185 = vmatprep.subr.mxu1 %v9728_v1 }
  0x70   :  { %7175 = vmatpush3.msra.mxu0 %v6242_v47  ;;  %7186 = vmatpush3.msra.mxu1 %v6242_v47 }
  0x71   :  { %7176 = vmatprep.subr.mxu0 %v9728_v1  ;;  %7187 = vmatprep.subr.mxu1 %v9728_v1 }
  0x72   :  { %7177 = vmatpush3.msra.mxu0 %v6241_v48  ;;  %7188 = vmatpush3.msra.mxu1 %v6241_v48 }
  0x73   :  { %7178 = vmatprep.subr.mxu0 %v9728_v1  ;;  %7189 = vmatprep.subr.mxu1 %v9728_v1 }
  0x74   :  { %7179 = vmatpush3.msra.mxu0 %v6240_v49  ;;  %7190 = vmatpush3.msra.mxu1 %v6240_v49  ;;  %v6244_v49 = vld.sshfl [vmem:[%s9722_s6 + $0x8] sm:$0x33 pattern:$0x75316420] }
  0x75   :  { %7180 = vmatprep.subr.mxu0 %v9728_v1  ;;  %7191 = vmatprep.subr.mxu1 %v9728_v1  ;;  %v1321_v2 = vcombine.high %v6244_v49, %v6244_v49 }
  0x76   :  { %7181 = vmatpush3.msra.mxu0 %v6239_v50  ;;  %7182 = vmatprep.mubr.msk.f32.mxu0 %vm7903_vm1, %v9728_v1 }
  0x77   :  { %7192 = vmatpush3.msra.mxu1 %v6239_v50  ;;  %7193 = vmatprep.mubr.msk.f32.mxu1 %vm7903_vm1, %v9728_v1 }
  0x78   :  { %7183 = vmatmul.mubr.msk.f32.vlgmr.msra.gmra.mxu0 %vm103_vm0, %v7991_v5  ;;  %7194 = vmatmul.mubr.msk.f32.vlgmr.msra.gmra.mxu1 %vm103_vm0, %v7996_v6  ;;  %v71_v5 = vshrl.u32 %v70_v3, 7 }
  0x79   :  { %7198 = vmatprep.mubr.msk.f32.mxu0 %vm1942_vm2, %v8311_v51  ;;  %7212 = vmatprep.mubr.msk.f32.mxu1 %vm1942_vm2, %v8311_v51 }
  0x7a   :  { %v8342_v9 = vsub.s32 %v69_v4, %v71_v5  ;;  %v8345_v13 = vsub.s32 0, %v71_v5 }
  0x7c   :  { %v704_v12 = vrot.slane %v6218_v8, %v8342_v9  ;;  %v711_v24 = vrot.slane %v697_v15, %v8342_v9 }
  0x7e   :  { %v717_v14 = vrot.slane %v704_v12, %v8345_v13  ;;  %v721_v27 = vrot.slane %v711_v24, %v8345_v13  ;;  %v712_v36 = vcombine.high %v704_v12, %v704_v12  ;;  %v713_v45 = vcombine.high %v711_v24, %v711_v24 }
  0x80   :  { %v725_v38 = vrot.slane %v712_v36, %v8345_v13  ;;  %v729_v46 = vrot.slane %v713_v45, %v8345_v13 }
  0xca   :  { %v8323_v52 = vpop.f32.mrf.mxu0  ;;  %v8325_v53 = vpop.f32.mrf.mxu1 }
  0xcc   :  { %v6942_v54 = vpop.f32.mrf.mxu0  ;;  %v6953_v55 = vpop.f32.mrf.mxu1 }
  0xd4   :  { %v8327_v56 = vpop.f32.mrf.mxu0  ;;  %v8329_v57 = vpop.f32.mrf.mxu1 }
  0xd6   :  { %v6964_v58 = vpop.f32.mrf.mxu0  ;;  %v6975_v59 = vpop.f32.mrf.mxu1 }
  0xd7   :  { %v8451_v59 = vrot.slane %v6244_v49, %v8342_v9 }
  0xde   :  { %v8331_v60 = vpop.f32.mrf.mxu0  ;;  %v8333_v61 = vpop.f32.mrf.mxu1 }
  0xe0   :  { %v6986_v62 = vpop.f32.mrf.mxu0  ;;  %v6997_v63 = vpop.f32.mrf.mxu1 }
  0xe1   :  { %v1341_v62 = vrot.slane %v8451_v59, %v8345_v13 }
  0xe8   :  { %v8335_v6 = vpop.f32.mrf.mxu0  ;;  %v8337_v7 = vpop.f32.mrf.mxu1 }
  0xea   :  { %v7008_v10 = vpop.f32.mrf.mxu0  ;;  %v7019_v11 = vpop.f32.mrf.mxu1 }
  0xeb   :  { %v8476_v10 = vrot.slane %v1321_v2, %v8342_v9  ;;  %v8701_v2 = vld [vmem:[%s9717_s1 + $0x28] sm:$0xff] }
  0xed   :  { %v1345_v11 = vrot.slane %v8476_v10, %v8345_v13 }
  0xf2   :  { %v800_v16 = vpop.f32.mrf.mxu0  ;;  %v870_v17 = vpop.f32.mrf.mxu1 }
  0xf3   :  { %v801_v18 = vadd.f32 %v800_v16, %v717_v14  ;;  %v871_v19 = vadd.f32 %v870_v17, %v717_v14 }
  0xf4   :  { %v7030_v20 = vpop.f32.mrf.mxu0  ;;  %v7041_v21 = vpop.f32.mrf.mxu1 }
  0xf5   :  { %7196 = vmatprep.subr.mxu0 %v801_v18  ;;  %7210 = vmatprep.subr.mxu1 %v871_v19 }
  0xf6   :  { %7197 = vmatpush3.msra.mxu0 %v801_v18  ;;  %7211 = vmatpush3.msra.mxu1 %v871_v19  ;;  %v1336_v19 = vcombine.high %v8451_v59, %v8451_v59 }
  0xf7   :  { %7199 = vmatmul.mubr.msk.f32.vlgmr.msra.gmra.mxu0 %vm1942_vm2, %v8351_v22  ;;  %7213 = vmatmul.mubr.msk.f32.vlgmr.msra.gmra.mxu1 %vm1942_vm2, %v8351_v22 }
  0xf8   :  { %7201 = vmatprep.mubr.msk.f32.mxu0 %vm1942_vm2, %v8356_v23  ;;  %7215 = vmatprep.mubr.msk.f32.mxu1 %vm1942_vm2, %v8356_v23 }
  0xfb   :  { %7202 = vmatmul.mubr.msk.f32.gmra.mxu0 %vm1942_vm2, %v8370_v25  ;;  %7216 = vmatmul.mubr.msk.f32.gmra.mxu1 %vm1942_vm2, %v8370_v25 }
  0xfc   :  { %7204 = vmatprep.mubr.msk.f32.mxu0 %vm1942_vm2, %v8375_v26  ;;  %7218 = vmatprep.mubr.msk.f32.mxu1 %vm1942_vm2, %v8375_v26  ;;  %v940_v29 = vpop.f32.mrf.mxu0  ;;  %v1010_v30 = vpop.f32.mrf.mxu1 }
  0xfd   :  { %v941_v32 = vadd.f32 %v940_v29, %v721_v27  ;;  %v1011_v33 = vadd.f32 %v1010_v30, %v721_v27  ;;  %v1349_v29 = vrot.slane %v1336_v19, %v8345_v13 }
  0xfe   :  { %v7052_v34 = vpop.f32.mrf.mxu0  ;;  %v7063_v35 = vpop.f32.mrf.mxu1 }
  0xff   :  { %7205 = vmatmul.mubr.msk.f32.gmra.mxu0 %vm1942_vm2, %v8389_v28  ;;  %7219 = vmatmul.mubr.msk.f32.gmra.mxu1 %vm1942_vm2, %v8389_v28 }
 0x100   :  { %7207 = vmatprep.mubr.msk.f32.mxu0 %vm1942_vm2, %v8394_v31  ;;  %7221 = vmatprep.mubr.msk.f32.mxu1 %vm1942_vm2, %v8394_v31 }
 0x101   :  { %7224 = vmatprep.subr.mxu0 %v941_v32  ;;  %7238 = vmatprep.subr.mxu1 %v1011_v33 }
 0x102   :  { %7225 = vmatpush3.msra.mxu0 %v941_v32  ;;  %7239 = vmatpush3.msra.mxu1 %v1011_v33 }
 0x103   :  { %7208 = vmatmul.mubr.msk.f32.gmra.mxu0 %vm1942_vm2, %v8407_v37  ;;  %7222 = vmatmul.mubr.msk.f32.gmra.mxu1 %vm1942_vm2, %v8407_v37 }
 0x104   :  { %7226 = vmatprep.mubr.msk.f32.mxu0 %vm1942_vm2, %v8311_v51  ;;  %7240 = vmatprep.mubr.msk.f32.mxu1 %vm1942_vm2, %v8311_v51 }
 0x106   :  { %v1080_v39 = vpop.f32.mrf.mxu0  ;;  %v1150_v40 = vpop.f32.mrf.mxu1 }
 0x107   :  { %7227 = vmatmul.mubr.msk.f32.vlgmr.msra.gmra.mxu0 %vm1942_vm2, %v8351_v22  ;;  %7241 = vmatmul.mubr.msk.f32.vlgmr.msra.gmra.mxu1 %vm1942_vm2, %v8351_v22  ;;  %v1081_v41 = vadd.f32 %v1080_v39, %v725_v38  ;;  %v1151_v42 = vadd.f32 %v1150_v40, %v725_v38  ;;  %v1337_v38 = vcombine.high %v8476_v10, %v8476_v10 }
 0x108   :  { %7229 = vmatprep.mubr.msk.f32.mxu0 %vm1942_vm2, %v8356_v23  ;;  %7243 = vmatprep.mubr.msk.f32.mxu1 %vm1942_vm2, %v8356_v23  ;;  %v7074_v43 = vpop.f32.mrf.mxu0  ;;  %v7085_v44 = vpop.f32.mrf.mxu1 }
 0x109   :  { %7252 = vmatprep.subr.mxu0 %v1081_v41  ;;  %7266 = vmatprep.subr.mxu1 %v1151_v42  ;;  %v1353_v39 = vrot.slane %v1337_v38, %v8345_v13 }
 0x10a   :  { %7253 = vmatpush3.msra.mxu0 %v1081_v41  ;;  %7267 = vmatpush3.msra.mxu1 %v1151_v42 }
 0x10b   :  { %7230 = vmatmul.mubr.msk.f32.gmra.mxu0 %vm1942_vm2, %v8370_v25  ;;  %7244 = vmatmul.mubr.msk.f32.gmra.mxu1 %vm1942_vm2, %v8370_v25 }
 0x10c   :  { %7232 = vmatprep.mubr.msk.f32.mxu0 %vm1942_vm2, %v8375_v26  ;;  %7246 = vmatprep.mubr.msk.f32.mxu1 %vm1942_vm2, %v8375_v26 }
 0x10f   :  { %7233 = vmatmul.mubr.msk.f32.gmra.mxu0 %vm1942_vm2, %v8389_v28  ;;  %7247 = vmatmul.mubr.msk.f32.gmra.mxu1 %vm1942_vm2, %v8389_v28 }
 0x110   :  { %7235 = vmatprep.mubr.msk.f32.mxu0 %vm1942_vm2, %v8394_v31  ;;  %7249 = vmatprep.mubr.msk.f32.mxu1 %vm1942_vm2, %v8394_v31  ;;  %v1220_v47 = vpop.f32.mrf.mxu0  ;;  %v1290_v48 = vpop.f32.mrf.mxu1 }
 0x111   :  { %v1221_v50 = vadd.f32 %v1220_v47, %v729_v46  ;;  %v1291_v54 = vadd.f32 %v1290_v48, %v729_v46  ;;  %v8679_v46 = vld [vmem:[%s9717_s1 + $0x38] sm:$0xff] }
 0x112   :  { %v7096_v55 = vpop.f32.mrf.mxu0  ;;  %v7107_v58 = vpop.f32.mrf.mxu1 }
 0x113   :  { %7236 = vmatmul.mubr.msk.f32.gmra.mxu0 %vm1942_vm2, %v8407_v37  ;;  %7250 = vmatmul.mubr.msk.f32.gmra.mxu1 %vm1942_vm2, %v8407_v37  ;;  %v8686_v55 = vld [vmem:[%s9717_s1 + $0x30] sm:$0xff] }
 0x114   :  { %7254 = vmatprep.mubr.msk.f32.mxu0 %vm1942_vm2, %v8311_v51  ;;  %7268 = vmatprep.mubr.msk.f32.mxu1 %vm1942_vm2, %v8311_v51 }
 0x115   :  { %7280 = vmatprep.subr.mxu0 %v1221_v50  ;;  %7294 = vmatprep.subr.mxu1 %v1291_v54 }
 0x117   :  { %7255 = vmatmul.mubr.msk.f32.vlgmr.msra.gmra.mxu0 %vm1942_vm2, %v8351_v22  ;;  %7269 = vmatmul.mubr.msk.f32.vlgmr.msra.gmra.mxu1 %vm1942_vm2, %v8351_v22 }
 0x118   :  { %7257 = vmatprep.mubr.msk.f32.mxu0 %vm1942_vm2, %v8356_v23  ;;  %7271 = vmatprep.mubr.msk.f32.mxu1 %vm1942_vm2, %v8356_v23 }
 0x119   :  { %7281 = vmatpush3.msra.mxu0 %v1221_v50  ;;  %7295 = vmatpush3.msra.mxu1 %v1291_v54 }
 0x11a   :  { %v1424_v63 = vpop.f32.mrf.mxu0  ;;  %v1494_v0 = vpop.f32.mrf.mxu1 }
 0x11b   :  { %7258 = vmatmul.mubr.msk.f32.gmra.mxu0 %vm1942_vm2, %v8370_v25  ;;  %7272 = vmatmul.mubr.msk.f32.gmra.mxu1 %vm1942_vm2, %v8370_v25  ;;  %v1425_v3 = vadd.f32 %v1424_v63, %v1341_v62  ;;  %v1495_v4 = vadd.f32 %v1494_v0, %v1341_v62 }
 0x11c   :  { %7260 = vmatprep.mubr.msk.f32.mxu0 %vm1942_vm2, %v8375_v26  ;;  %7274 = vmatprep.mubr.msk.f32.mxu1 %vm1942_vm2, %v8375_v26  ;;  %v7118_v5 = vpop.f32.mrf.mxu0  ;;  %v7129_v8 = vpop.f32.mrf.mxu1 }
 0x11d   :  { %7308 = vmatprep.subr.mxu0 %v1425_v3  ;;  %7322 = vmatprep.subr.mxu1 %v1495_v4 }
 0x11f   :  { %7261 = vmatmul.mubr.msk.f32.gmra.mxu0 %vm1942_vm2, %v8389_v28  ;;  %7275 = vmatmul.mubr.msk.f32.gmra.mxu1 %vm1942_vm2, %v8389_v28 }
 0x120   :  { %7263 = vmatprep.mubr.msk.f32.mxu0 %vm1942_vm2, %v8394_v31  ;;  %7277 = vmatprep.mubr.msk.f32.mxu1 %vm1942_vm2, %v8394_v31 }
 0x123   :  { %7264 = vmatmul.mubr.msk.f32.gmra.mxu0 %vm1942_vm2, %v8407_v37  ;;  %7278 = vmatmul.mubr.msk.f32.gmra.mxu1 %vm1942_vm2, %v8407_v37 }
 0x124   :  { %7282 = vmatprep.mubr.msk.f32.mxu0 %vm1942_vm2, %v8311_v51  ;;  %7296 = vmatprep.mubr.msk.f32.mxu1 %vm1942_vm2, %v8311_v51  ;;  %v1564_v12 = vpop.f32.mrf.mxu0  ;;  %v1634_v14 = vpop.f32.mrf.mxu1 }
 0x125   :  { %v1565_v15 = vadd.f32 %v1564_v12, %v1345_v11  ;;  %v1635_v16 = vadd.f32 %v1634_v14, %v1345_v11  ;;  %v8720_v12 = vld [vmem:[%s9717_s1 + $0x20] sm:$0xff] }
 0x126   :  { %v7140_v17 = vpop.f32.mrf.mxu0  ;;  %v7151_v18 = vpop.f32.mrf.mxu1 }
 0x127   :  { %7283 = vmatmul.mubr.msk.f32.vlgmr.msra.gmra.mxu0 %vm1942_vm2, %v8351_v22  ;;  %7297 = vmatmul.mubr.msk.f32.vlgmr.msra.gmra.mxu1 %vm1942_vm2, %v8351_v22 }
 0x128   :  { %7285 = vmatprep.mubr.msk.f32.mxu0 %vm1942_vm2, %v8356_v23  ;;  %7299 = vmatprep.mubr.msk.f32.mxu1 %vm1942_vm2, %v8356_v23 }
 0x129   :  { %7309 = vmatpush3.msra.mxu0 %v1425_v3  ;;  %7323 = vmatpush3.msra.mxu1 %v1495_v4 }
 0x12a   :  { %7336 = vmatprep.subr.mxu0 %v1565_v15  ;;  %7350 = vmatprep.subr.mxu1 %v1635_v16 }
 0x12b   :  { %7286 = vmatmul.mubr.msk.f32.gmra.mxu0 %vm1942_vm2, %v8370_v25  ;;  %7300 = vmatmul.mubr.msk.f32.gmra.mxu1 %vm1942_vm2, %v8370_v25 }
 0x12c   :  { %7288 = vmatprep.mubr.msk.f32.mxu0 %vm1942_vm2, %v8375_v26  ;;  %7302 = vmatprep.mubr.msk.f32.mxu1 %vm1942_vm2, %v8375_v26 }
 0x12e   :  { %v1704_v20 = vpop.f32.mrf.mxu0  ;;  %v1774_v21 = vpop.f32.mrf.mxu1 }
 0x12f   :  { %7289 = vmatmul.mubr.msk.f32.gmra.mxu0 %vm1942_vm2, %v8389_v28  ;;  %7303 = vmatmul.mubr.msk.f32.gmra.mxu1 %vm1942_vm2, %v8389_v28  ;;  %v1705_v30 = vadd.f32 %v1704_v20, %v1349_v29  ;;  %v1775_v32 = vadd.f32 %v1774_v21, %v1349_v29  ;;  %v8739_v20 = vld [vmem:[%s9717_s1 + $0x18] sm:$0xff] }
 0x130   :  { %7291 = vmatprep.mubr.msk.f32.mxu0 %vm1942_vm2, %v8394_v31  ;;  %7305 = vmatprep.mubr.msk.f32.mxu1 %vm1942_vm2, %v8394_v31  ;;  %v7162_v24 = vpop.f32.mrf.mxu0  ;;  %v7173_v27 = vpop.f32.mrf.mxu1 }
 0x133   :  { %7292 = vmatmul.mubr.msk.f32.gmra.mxu0 %vm1942_vm2, %v8407_v37  ;;  %7306 = vmatmul.mubr.msk.f32.gmra.mxu1 %vm1942_vm2, %v8407_v37 }
 0x134   :  { %7310 = vmatprep.mubr.msk.f32.mxu0 %vm1942_vm2, %v8311_v51  ;;  %7324 = vmatprep.mubr.msk.f32.mxu1 %vm1942_vm2, %v8311_v51 }
 0x137   :  { %7311 = vmatmul.mubr.msk.f32.vlgmr.msra.gmra.mxu0 %vm1942_vm2, %v8351_v22  ;;  %7325 = vmatmul.mubr.msk.f32.vlgmr.msra.gmra.mxu1 %vm1942_vm2, %v8351_v22 }
 0x138   :  { %7313 = vmatprep.mubr.msk.f32.mxu0 %vm1942_vm2, %v8356_v23  ;;  %7327 = vmatprep.mubr.msk.f32.mxu1 %vm1942_vm2, %v8356_v23  ;;  %v1844_v33 = vpop.f32.mrf.mxu0  ;;  %v1914_v34 = vpop.f32.mrf.mxu1 }
 0x139   :  { %7337 = vmatpush3.msra.mxu0 %v1565_v15  ;;  %7351 = vmatpush3.msra.mxu1 %v1635_v16  ;;  %v1845_v40 = vadd.f32 %v1844_v33, %v1353_v39  ;;  %v1915_v41 = vadd.f32 %v1914_v34, %v1353_v39  ;;  %v8759_v34 = vld [vmem:[%s9717_s1 + $0x10] sm:$0xff] }
 0x13a   :  { %7364 = vmatprep.subr.mxu0 %v1705_v30  ;;  %7378 = vmatprep.subr.mxu1 %v1775_v32  ;;  %v7184_v35 = vpop.f32.mrf.mxu0  ;;  %v7195_v36 = vpop.f32.mrf.mxu1 }
 0x13b   :  { %7314 = vmatmul.mubr.msk.f32.gmra.mxu0 %vm1942_vm2, %v8370_v25  ;;  %7328 = vmatmul.mubr.msk.f32.gmra.mxu1 %vm1942_vm2, %v8370_v25 }
 0x13c   :  { %7316 = vmatprep.mubr.msk.f32.mxu0 %vm1942_vm2, %v8375_v26  ;;  %7330 = vmatprep.mubr.msk.f32.mxu1 %vm1942_vm2, %v8375_v26 }
 0x13f   :  { %7317 = vmatmul.mubr.msk.f32.gmra.mxu0 %vm1942_vm2, %v8389_v28  ;;  %7331 = vmatmul.mubr.msk.f32.gmra.mxu1 %vm1942_vm2, %v8389_v28 }
 0x140   :  { %7319 = vmatprep.mubr.msk.f32.mxu0 %vm1942_vm2, %v8394_v31  ;;  %7333 = vmatprep.mubr.msk.f32.mxu1 %vm1942_vm2, %v8394_v31 }
 0x143   :  { %7320 = vmatmul.mubr.msk.f32.gmra.mxu0 %vm1942_vm2, %v8407_v37  ;;  %7334 = vmatmul.mubr.msk.f32.gmra.mxu1 %vm1942_vm2, %v8407_v37 }
 0x144   :  { %7338 = vmatprep.mubr.msk.f32.mxu0 %vm1942_vm2, %v8311_v51  ;;  %7352 = vmatprep.mubr.msk.f32.mxu1 %vm1942_vm2, %v8311_v51 }
 0x147   :  { %7339 = vmatmul.mubr.msk.f32.vlgmr.msra.gmra.mxu0 %vm1942_vm2, %v8351_v22  ;;  %7353 = vmatmul.mubr.msk.f32.vlgmr.msra.gmra.mxu1 %vm1942_vm2, %v8351_v22 }
 0x148   :  { %7365 = vmatpush3.msra.mxu0 %v1705_v30  ;;  %7379 = vmatpush3.msra.mxu1 %v1775_v32  ;;  %v8752_v30 = vld.sshfl [vmem:[%s9722_s6] sm:$0x33 pattern:$0x75316420] }
 0x149   :  { %7341 = vmatprep.mubr.msk.f32.mxu0 %vm1942_vm2, %v8356_v23  ;;  %7355 = vmatprep.mubr.msk.f32.mxu1 %vm1942_vm2, %v8356_v23  ;;  %v8765_v38 = vrot.slane %v8752_v30, %v8342_v9 }
 0x14a   :  { %7392 = vmatprep.subr.mxu0 %v1845_v40  ;;  %7406 = vmatprep.subr.mxu1 %v1915_v41 }
 0x14b   :  { %7342 = vmatmul.mubr.msk.f32.gmra.mxu0 %vm1942_vm2, %v8370_v25  ;;  %7356 = vmatmul.mubr.msk.f32.gmra.mxu1 %vm1942_vm2, %v8370_v25 }
 0x14c   :  { %7344 = vmatprep.mubr.msk.f32.mxu0 %vm1942_vm2, %v8375_v26  ;;  %7358 = vmatprep.mubr.msk.f32.mxu1 %vm1942_vm2, %v8375_v26 }
 0x14f   :  { %7345 = vmatmul.mubr.msk.f32.gmra.mxu0 %vm1942_vm2, %v8389_v28  ;;  %7359 = vmatmul.mubr.msk.f32.gmra.mxu1 %vm1942_vm2, %v8389_v28 }
 0x150   :  { %7347 = vmatprep.mubr.msk.f32.mxu0 %vm1942_vm2, %v8394_v31  ;;  %7361 = vmatprep.mubr.msk.f32.mxu1 %vm1942_vm2, %v8394_v31 }
 0x153   :  { %7348 = vmatmul.mubr.msk.f32.gmra.mxu0 %vm1942_vm2, %v8407_v37  ;;  %7362 = vmatmul.mubr.msk.f32.gmra.mxu1 %vm1942_vm2, %v8407_v37 }
 0x154   :  { %7366 = vmatprep.mubr.msk.f32.mxu0 %vm1942_vm2, %v8311_v51  ;;  %7380 = vmatprep.mubr.msk.f32.mxu1 %vm1942_vm2, %v8311_v51 }
 0x157   :  { %7367 = vmatmul.mubr.msk.f32.vlgmr.msra.gmra.mxu0 %vm1942_vm2, %v8351_v22  ;;  %7381 = vmatmul.mubr.msk.f32.vlgmr.msra.gmra.mxu1 %vm1942_vm2, %v8351_v22 }
 0x158   :  { %7393 = vmatpush3.msra.mxu0 %v1845_v40  ;;  %7407 = vmatpush3.msra.mxu1 %v1915_v41 }
 0x159   :  { %7369 = vmatprep.mubr.msk.f32.mxu0 %vm1942_vm2, %v8356_v23  ;;  %7383 = vmatprep.mubr.msk.f32.mxu1 %vm1942_vm2, %v8356_v23 }
 0x15a   :  { %7420 = vmatprep.subr.mxu0 %v9728_v1  ;;  %7439 = vmatprep.subr.mxu1 %v9728_v1 }
 0x15b   :  { %7370 = vmatmul.mubr.msk.f32.gmra.mxu0 %vm1942_vm2, %v8370_v25  ;;  %7384 = vmatmul.mubr.msk.f32.gmra.mxu1 %vm1942_vm2, %v8370_v25 }
 0x15c   :  { %7372 = vmatprep.mubr.msk.f32.mxu0 %vm1942_vm2, %v8375_v26  ;;  %7386 = vmatprep.mubr.msk.f32.mxu1 %vm1942_vm2, %v8375_v26 }
 0x15f   :  { %7373 = vmatmul.mubr.msk.f32.gmra.mxu0 %vm1942_vm2, %v8389_v28  ;;  %7387 = vmatmul.mubr.msk.f32.gmra.mxu1 %vm1942_vm2, %v8389_v28 }
 0x160   :  { %7375 = vmatprep.mubr.msk.f32.mxu0 %vm1942_vm2, %v8394_v31  ;;  %7389 = vmatprep.mubr.msk.f32.mxu1 %vm1942_vm2, %v8394_v31 }
 0x163   :  { %7376 = vmatmul.mubr.msk.f32.gmra.mxu0 %vm1942_vm2, %v8407_v37  ;;  %7390 = vmatmul.mubr.msk.f32.gmra.mxu1 %vm1942_vm2, %v8407_v37 }
 0x164   :  { %7394 = vmatprep.mubr.msk.f32.mxu0 %vm1942_vm2, %v8311_v51  ;;  %7408 = vmatprep.mubr.msk.f32.mxu1 %vm1942_vm2, %v8311_v51 }
 0x167   :  { %7395 = vmatmul.mubr.msk.f32.vlgmr.msra.gmra.mxu0 %vm1942_vm2, %v8351_v22  ;;  %7409 = vmatmul.mubr.msk.f32.vlgmr.msra.gmra.mxu1 %vm1942_vm2, %v8351_v22 }
 0x168   :  { %7397 = vmatprep.mubr.msk.f32.mxu0 %vm1942_vm2, %v8356_v23  ;;  %7411 = vmatprep.mubr.msk.f32.mxu1 %vm1942_vm2, %v8356_v23 }
 0x16b   :  { %7398 = vmatmul.mubr.msk.f32.gmra.mxu0 %vm1942_vm2, %v8370_v25  ;;  %7412 = vmatmul.mubr.msk.f32.gmra.mxu1 %vm1942_vm2, %v8370_v25 }
 0x16c   :  { %7400 = vmatprep.mubr.msk.f32.mxu0 %vm1942_vm2, %v8375_v26  ;;  %7414 = vmatprep.mubr.msk.f32.mxu1 %vm1942_vm2, %v8375_v26 }
 0x16f   :  { %7401 = vmatmul.mubr.msk.f32.gmra.mxu0 %vm1942_vm2, %v8389_v28  ;;  %7415 = vmatmul.mubr.msk.f32.gmra.mxu1 %vm1942_vm2, %v8389_v28 }
 0x170   :  { %7403 = vmatprep.mubr.msk.f32.mxu0 %vm1942_vm2, %v8394_v31  ;;  %7417 = vmatprep.mubr.msk.f32.mxu1 %vm1942_vm2, %v8394_v31 }
 0x173   :  { %7404 = vmatmul.mubr.msk.f32.gmra.mxu0 %vm1942_vm2, %v8407_v37  ;;  %7418 = vmatmul.mubr.msk.f32.gmra.mxu1 %vm1942_vm2, %v8407_v37 }
 0x174   :  { %7436 = vmatprep.mubr.msk.f32.mxu0 %vm7903_vm1, %v9728_v1  ;;  %7455 = vmatprep.mubr.msk.f32.mxu1 %vm7903_vm1, %v9728_v1 }
 0x1b7   :  { %v8664_v51 = vpop.f32.mrf.mxu0  ;;  %v8666_v22 = vpop.f32.mrf.mxu1 }
 0x1b9   :  { %v8668_v23 = vpop.f32.mrf.mxu0  ;;  %v8670_v25 = vpop.f32.mrf.mxu1 }
 0x1bb   :  { %v7203_v26 = vpop.f32.mrf.mxu0  ;;  %v7217_v28 = vpop.f32.mrf.mxu1 }
 0x1bc   :  { %v2049_v32 = vadd.f32 %v7203_v26, %v8739_v20  ;;  %v2154_v33 = vadd.f32 %v7217_v28, %v8739_v20  ;;  %v8780_v28 = vld [vmem:[%s9717_s1 + $0x8] sm:$0xff] }
 0x1bd   :  { %v8672_v31 = vpop.f32.mrf.mxu0  ;;  %v8674_v42 = vpop.f32.mrf.mxu1 }
 0x1be   :  { %v2044_v41 = vadd.f32 %v8672_v31, %v8759_v34  ;;  %v2149_v26 = vadd.f32 %v8674_v42, %v8759_v34 }
 0x1bf   :  { %v7206_v37 = vpop.f32.mrf.mxu0  ;;  %v7220_v43 = vpop.f32.mrf.mxu1 }
 0x1c0   :  { %v2059_v10 = vadd.f32 %v7206_v37, %v8701_v2  ;;  %v2164_v11 = vadd.f32 %v7220_v43, %v8701_v2 }
 0x1c1   :  { %v2053_v44 = vpop.f32.mrf.mxu0  ;;  %v2158_v45 = vpop.f32.mrf.mxu1 }
 0x1c2   :  { %v2054_v18 = vadd.f32 %v2053_v44, %v8720_v12  ;;  %v2159_v19 = vadd.f32 %v2158_v45, %v8720_v12  ;;  %v86_v44 = vrot.slane %v8765_v38, %v8345_v13  ;;  %v2039_v45 = vadd.f32 %v8664_v51, %v8780_v28 }
 0x1c3   :  { %v7209_v47 = vpop.f32.mrf.mxu0  ;;  %v7223_v48 = vpop.f32.mrf.mxu1 }
 0x1c4   :  { %v2069_v49 = vadd.f32 %v7209_v47, %v8679_v46  ;;  %v2174_v50 = vadd.f32 %v7223_v48, %v8679_v46  ;;  %v2144_v47 = vadd.f32 %v8666_v22, %v8780_v28  ;;  %v8803_v48 = vld [vmem:[%s9717_s1] sm:$0xff]  ;;  %v247_v51 = vadd.f32 %v8325_v53, %v86_v44 }
 0x1c5   :  { %v2063_v54 = vpop.f32.mrf.mxu0  ;;  %v2168_v58 = vpop.f32.mrf.mxu1 }
 0x1c6   :  { %7421 = vmatpush3.xpose.msk.msra.mxu0 %vm1942_vm2, %v2069_v49  ;;  %7440 = vmatpush3.xpose.msk.msra.mxu1 %vm1942_vm2, %v2174_v50  ;;  %v2064_v63 = vadd.f32 %v2063_v54, %v8686_v55  ;;  %v2169_v0 = vadd.f32 %v2168_v58, %v8686_v55  ;;  %v174_v54 = vadd.f32 %v8323_v52, %v86_v44 }
 0x1c7   :  { %7422 = vmatprep.subr.mxu0 %v9728_v1  ;;  %7441 = vmatprep.subr.mxu1 %v9728_v1  ;;  %v8692_v59 = vpop.f32.mrf.mxu0  ;;  %v8694_v62 = vpop.f32.mrf.mxu1 }
 0x1c9   :  { %v8703_v3 = vpop.f32.mrf.mxu0  ;;  %v8705_v4 = vpop.f32.mrf.mxu1 }
 0x1ca   :  { %7423 = vmatpush3.xpose.msk.msra.mxu0 %vm1942_vm2, %v2064_v63  ;;  %7442 = vmatpush3.xpose.msk.msra.mxu1 %vm1942_vm2, %v2169_v0  ;;  %v2034_v63 = vadd.f32 %v8668_v23, %v8803_v48  ;;  %v2139_v0 = vadd.f32 %v8670_v25, %v8803_v48 }
 0x1cb   :  { %7424 = vmatprep.subr.mxu0 %v9728_v1  ;;  %7443 = vmatprep.subr.mxu1 %v9728_v1  ;;  %v8711_v5 = vpop.f32.mrf.mxu0  ;;  %v8713_v8 = vpop.f32.mrf.mxu1 }
 0x1cd   :  { %v8722_v14 = vpop.f32.mrf.mxu0  ;;  %v8724_v15 = vpop.f32.mrf.mxu1 }
 0x1ce   :  { %7425 = vmatpush3.xpose.msk.msra.mxu0 %vm1942_vm2, %v2059_v10  ;;  %7444 = vmatpush3.xpose.msk.msra.mxu1 %vm1942_vm2, %v2164_v11 }
 0x1cf   :  { %7426 = vmatprep.subr.mxu0 %v9728_v1  ;;  %7445 = vmatprep.subr.mxu1 %v9728_v1  ;;  %v8730_v16 = vpop.f32.mrf.mxu0  ;;  %v8732_v17 = vpop.f32.mrf.mxu1 }
 0x1d1   :  { %v8741_v21 = vpop.f32.mrf.mxu0  ;;  %v8743_v24 = vpop.f32.mrf.mxu1 }
 0x1d2   :  { %7427 = vmatpush3.xpose.msk.msra.mxu0 %vm1942_vm2, %v2054_v18  ;;  %7446 = vmatpush3.xpose.msk.msra.mxu1 %vm1942_vm2, %v2159_v19  ;;  %v1918_v18 = vmul.f32 0.35355338, %v174_v54  ;;  %v1919_v19 = vmul.f32 0.35355338, %v247_v51  ;;  %v2374_v54 = vadd.f32 %v8732_v17, %v8701_v2  ;;  %v2369_v17 = vadd.f32 %v8743_v24, %v8720_v12 }
 0x1d3   :  { %7428 = vmatprep.subr.mxu0 %v9728_v1  ;;  %7447 = vmatprep.subr.mxu1 %v9728_v1  ;;  %v7237_v27 = vpop.f32.mrf.mxu0  ;;  %v7251_v29 = vpop.f32.mrf.mxu1  ;;  %v2259_v24 = vadd.f32 %v8711_v5, %v8739_v20 }
 0x1d4   :  { %v2279_v52 = vadd.f32 %v7237_v27, %v8679_v46  ;;  %v2384_v53 = vadd.f32 %v7251_v29, %v8679_v46 }
 0x1d5   :  { %v2273_v35 = vpop.f32.mrf.mxu0  ;;  %v2378_v36 = vpop.f32.mrf.mxu1 }
 0x1d6   :  { %7429 = vmatpush3.xpose.msk.msra.mxu0 %vm1942_vm2, %v2049_v32  ;;  %7448 = vmatpush3.xpose.msk.msra.mxu1 %vm1942_vm2, %v2154_v33 }
 0x1d7   :  { %7430 = vmatprep.subr.mxu0 %v9728_v1  ;;  %7449 = vmatprep.subr.mxu1 %v9728_v1  ;;  %v8769_v39 = vpop.f32.mrf.mxu0  ;;  %v8771_v40 = vpop.f32.mrf.mxu1 }
 0x1d9   :  { %v8782_v37 = vpop.f32.mrf.mxu0  ;;  %v8784_v43 = vpop.f32.mrf.mxu1 }
 0x1da   :  { %7431 = vmatpush3.xpose.msk.msra.mxu0 %vm1942_vm2, %v2044_v41  ;;  %7450 = vmatpush3.xpose.msk.msra.mxu1 %vm1942_vm2, %v2149_v26  ;;  %v2274_v41 = vadd.f32 %v2273_v35, %v8686_v55  ;;  %v2379_v26 = vadd.f32 %v2378_v36, %v8686_v55 }
 0x1db   :  { %7432 = vmatprep.subr.mxu0 %v9728_v1  ;;  %7451 = vmatprep.subr.mxu1 %v9728_v1  ;;  %v8792_v31 = vpop.f32.mrf.mxu0  ;;  %v8794_v42 = vpop.f32.mrf.mxu1 }
 0x1dd   :  { %v8805_v49 = vpop.f32.mrf.mxu0  ;;  %v8807_v50 = vpop.f32.mrf.mxu1 }
 0x1de   :  { %7433 = vmatpush3.xpose.msk.msra.mxu0 %vm1942_vm2, %v2039_v45  ;;  %7452 = vmatpush3.xpose.msk.msra.mxu1 %vm1942_vm2, %v2144_v47  ;;  %v2269_v47 = vadd.f32 %v8730_v16, %v8701_v2  ;;  %v2264_v16 = vadd.f32 %v8741_v21, %v8720_v12 }
 0x1df   :  { %7434 = vmatprep.subr.mxu0 %v9728_v1  ;;  %7453 = vmatprep.subr.mxu1 %v9728_v1  ;;  %v8815_v22 = vpop.f32.mrf.mxu0  ;;  %v8817_v58 = vpop.f32.mrf.mxu1 }
 0x1e1   :  { %v8823_v10 = vpop.f32.mrf.mxu0  ;;  %v8825_v11 = vpop.f32.mrf.mxu1 }
 0x1e2   :  { %7435 = vmatpush3.xpose.msk.msra.mxu0 %vm1942_vm2, %v2034_v63  ;;  %7454 = vmatpush3.xpose.msk.msra.mxu1 %vm1942_vm2, %v2139_v0 }
 0x1e3   :  { %7458 = vmatprep.subr.mxu0 %v9728_v1  ;;  %7477 = vmatprep.subr.mxu1 %v9728_v1  ;;  %v8833_v23 = vpop.f32.mrf.mxu0  ;;  %v8835_v25 = vpop.f32.mrf.mxu1 }
 0x1e5   :  { %7437 = vmatmul.mubr.msk.f32.vlgmr.msra.gmra.mxu0 %vm1942_vm2, %v1918_v18  ;;  %7456 = vmatmul.mubr.msk.f32.vlgmr.msra.gmra.mxu1 %vm1942_vm2, %v1919_v19  ;;  %v8839_v32 = vpop.f32.mrf.mxu0  ;;  %v8841_v33 = vpop.f32.mrf.mxu1  ;;  %v66_v19 = vcombine.high %v8752_v30, %v8752_v30 }
 0x1e6   :  { %7459 = vmatpush3.xpose.msk.msra.mxu0 %vm1942_vm2, %v2279_v52  ;;  %7478 = vmatpush3.xpose.msk.msra.mxu1 %vm1942_vm2, %v2384_v53 }
 0x1e7   :  { %7460 = vmatprep.subr.mxu0 %v9728_v1  ;;  %7479 = vmatprep.subr.mxu1 %v9728_v1  ;;  %v8847_v27 = vpop.f32.mrf.mxu0  ;;  %v8849_v29 = vpop.f32.mrf.mxu1  ;;  %v8914_v30 = vrot.slane %v66_v19, %v8342_v9 }
 0x1e8   :  { %7474 = vmatprep.mubr.msk.f32.mxu0 %vm7903_vm1, %v9728_v1  ;;  %7493 = vmatprep.mubr.msk.f32.mxu1 %vm7903_vm1, %v9728_v1 }
 0x1e9   :  { %v8857_v44 = vpop.f32.mrf.mxu0  ;;  %v8859_v45 = vpop.f32.mrf.mxu1  ;;  %v90_v9 = vrot.slane %v8914_v30, %v8345_v13 }
 0x1ea   :  { %7461 = vmatpush3.xpose.msk.msra.mxu0 %vm1942_vm2, %v2274_v41  ;;  %7480 = vmatpush3.xpose.msk.msra.mxu1 %vm1942_vm2, %v2379_v26  ;;  %v2364_v26 = vadd.f32 %v8713_v8, %v8739_v20  ;;  %v2254_v8 = vadd.f32 %v8722_v14, %v8759_v34 }
 0x1eb   :  { %7462 = vmatprep.subr.mxu0 %v9728_v1  ;;  %7481 = vmatprep.subr.mxu1 %v9728_v1  ;;  %v8865_v35 = vpop.f32.mrf.mxu0  ;;  %v8867_v36 = vpop.f32.mrf.mxu1 }
 0x1ed   :  { %v8873_v51 = vpop.f32.mrf.mxu0  ;;  %v8875_v63 = vpop.f32.mrf.mxu1 }
 0x1ee   :  { %7463 = vmatpush3.xpose.msk.msra.mxu0 %vm1942_vm2, %v2269_v47  ;;  %7482 = vmatpush3.xpose.msk.msra.mxu1 %vm1942_vm2, %v2374_v54 }
 0x1ef   :  { %7464 = vmatprep.subr.mxu0 %v9728_v1  ;;  %7483 = vmatprep.subr.mxu1 %v9728_v1  ;;  %v8881_v0 = vpop.f32.mrf.mxu0  ;;  %v8883_v52 = vpop.f32.mrf.mxu1 }
 0x1f1   :  { %v8889_v53 = vpop.f32.mrf.mxu0  ;;  %v8891_v18 = vpop.f32.mrf.mxu1 }
 0x1f2   :  { %7465 = vmatpush3.xpose.msk.msra.mxu0 %vm1942_vm2, %v2264_v16  ;;  %7484 = vmatpush3.xpose.msk.msra.mxu1 %vm1942_vm2, %v2369_v17  ;;  %v2359_v17 = vadd.f32 %v8724_v15, %v8759_v34  ;;  %v2249_v15 = vadd.f32 %v8692_v59, %v8780_v28 }
 0x1f3   :  { %7466 = vmatprep.subr.mxu0 %v9728_v1  ;;  %7485 = vmatprep.subr.mxu1 %v9728_v1  ;;  %v8899_v41 = vpop.f32.mrf.mxu0  ;;  %v8901_v21 = vpop.f32.mrf.mxu1 }
 0x1f5   :  { %v8907_v47 = vpop.f32.mrf.mxu0  ;;  %v8909_v54 = vpop.f32.mrf.mxu1 }
 0x1f6   :  { %7467 = vmatpush3.xpose.msk.msra.mxu0 %vm1942_vm2, %v2259_v24  ;;  %7486 = vmatpush3.xpose.msk.msra.mxu1 %vm1942_vm2, %v2364_v26 }
 0x1f7   :  { %7468 = vmatprep.subr.mxu0 %v9728_v1  ;;  %7487 = vmatprep.subr.mxu1 %v9728_v1  ;;  %v8918_v16 = vpop.f32.mrf.mxu0  ;;  %v8920_v5 = vpop.f32.mrf.mxu1 }
 0x1f8   :  { %9730 = vst [vmem:[#allocation5_spill] sm:$0xff] %v8918_v16  ;;  %9731 = vst [vmem:[#allocation6_spill] sm:$0xff] %v8920_v5  ;;  %v9738_v5 = vmov 0.0  }
 0x1f9   :  { %v8926_v24 = vpop.f32.mrf.mxu0  ;;  %v8928_v26 = vpop.f32.mrf.mxu1 }
 0x1fa   :  { %9732 = vst [vmem:[#allocation7_spill] sm:$0xff] %v8926_v24  ;;  %9733 = vst [vmem:[#allocation8_spill] sm:$0xff] %v8928_v26  ;;  %7469 = vmatpush3.xpose.msk.msra.mxu0 %vm1942_vm2, %v2254_v8  ;;  %7488 = vmatpush3.xpose.msk.msra.mxu1 %vm1942_vm2, %v2359_v17  ;;  %v2354_v26 = vadd.f32 %v8694_v62, %v8780_v28  ;;  %v387_v24 = vadd.f32 %v8329_v57, %v90_v9 }
 0x1fb   :  { %7470 = vmatprep.subr.mxu0 %v9728_v1  ;;  %7489 = vmatprep.subr.mxu1 %v9728_v1  ;;  %v8936_v19 = vpop.f32.mrf.mxu0  ;;  %v8938_v14 = vpop.f32.mrf.mxu1  ;;  %v317_v1 = vadd.f32 %v8327_v56, %v90_v9  ;;  %v2244_v62 = vadd.f32 %v8703_v3, %v8803_v48  ;;  %v2489_v56 = vadd.f32 %v8833_v23, %v8679_v46 }
 0x1fc   :  { %9734 = vst [vmem:[#allocation9_spill] sm:$0xff] %v8936_v19  ;;  %9735 = vst [vmem:[#allocation10_spill] sm:$0xff] %v8938_v14  ;;  %v2594_v57 = vadd.f32 %v8835_v25, %v8679_v46  ;;  %v8993_v25 = vld [vmem:[%s9718_s2 + $0x8] sm:$0xff] }
 0x1fd   :  { %v8944_v8 = vpop.f32.mrf.mxu0  ;;  %v8946_v17 = vpop.f32.mrf.mxu1  ;;  %v1920_v9 = vmul.f32 0.35355338, %v317_v1  ;;  %v2484_v1 = vadd.f32 %v8839_v32, %v8686_v55 }
 0x1fe   :  { %9736 = vst [vmem:[#allocation11_spill] sm:$0xff] %v8944_v8  ;;  %9737 = vst [vmem:[#allocation12_spill] sm:$0xff] %v8946_v17  ;;  %7471 = vmatpush3.xpose.msk.msra.mxu0 %vm1942_vm2, %v2249_v15  ;;  %7490 = vmatpush3.xpose.msk.msra.mxu1 %vm1942_vm2, %v2354_v26  ;;  %v2349_v15 = vadd.f32 %v8705_v4, %v8803_v48  ;;  %v1921_v8 = vmul.f32 0.35355338, %v387_v24 }
 0x1ff   :  { %7472 = vmatprep.subr.mxu0 %v9738_v5  ;;  %7491 = vmatprep.subr.mxu1 %v9738_v5  ;;  %v8954_v59 = vpop.f32.mrf.mxu0  ;;  %v8956_v16 = vpop.f32.mrf.mxu1 }
 0x201   :  { %v8962_v17 = vpop.f32.mrf.mxu0  ;;  %v8964_v26 = vpop.f32.mrf.mxu1 }
 0x202   :  { %7473 = vmatpush3.xpose.msk.msra.mxu0 %vm1942_vm2, %v2244_v62  ;;  %7492 = vmatpush3.xpose.msk.msra.mxu1 %vm1942_vm2, %v2349_v15  ;;  %v2589_v15 = vadd.f32 %v8841_v33, %v8686_v55 }
 0x203   :  { %7496 = vmatprep.subr.mxu0 %v9738_v5  ;;  %7515 = vmatprep.subr.mxu1 %v9738_v5  ;;  %v8974_v3 = vpop.f32.mrf.mxu0  ;;  %v8976_v4 = vpop.f32.mrf.mxu1 }
 0x205   :  { %7475 = vmatmul.mubr.msk.f32.vlgmr.msra.gmra.mxu0 %vm1942_vm2, %v1920_v9  ;;  %7494 = vmatmul.mubr.msk.f32.vlgmr.msra.gmra.mxu1 %vm1942_vm2, %v1921_v8  ;;  %v8980_v62 = vpop.f32.mrf.mxu0  ;;  %v8982_v23 = vpop.f32.mrf.mxu1 }
 0x206   :  { %7497 = vmatpush3.xpose.msk.msra.mxu0 %vm1942_vm2, %v2489_v56  ;;  %7516 = vmatpush3.xpose.msk.msra.mxu1 %vm1942_vm2, %v2594_v57  ;;  %v9010_v57 = vld [vmem:[%s9718_s2] sm:$0xff] }
 0x207   :  { %7498 = vmatprep.subr.mxu0 %v9738_v5  ;;  %7517 = vmatprep.subr.mxu1 %v9738_v5  ;;  %v7340_v24 = vpop.f32.mrf.mxu0  ;;  %v7354_v8 = vpop.f32.mrf.mxu1 }
 0x208   :  { %7512 = vmatprep.mubr.msk.f32.mxu0 %vm7903_vm1, %v9738_v5  ;;  %7531 = vmatprep.mubr.msk.f32.mxu1 %vm7903_vm1, %v9738_v5  ;;  %v9002_v32 = vadd.f32 %v7340_v24, %v8993_v25  ;;  %v9005_v56 = vadd.f32 %v7354_v8, %v8993_v25  ;;  %v9025_v8 = vld [vmem:[%s9718_s2 + $0x18] sm:$0xff] }
 0x209   :  { %v3091_v9 = vpop.f32.mrf.mxu0  ;;  %v3196_v14 = vpop.f32.mrf.mxu1 }
 0x20a   :  { %9739 = vst [vmem:[#allocation13_spill] sm:$0xff] %v9002_v32  ;;  %9740 = vst [vmem:[#allocation14_spill] sm:$0xff] %v9005_v56  ;;  %7499 = vmatpush3.xpose.msk.msra.mxu0 %vm1942_vm2, %v2484_v1  ;;  %7518 = vmatpush3.xpose.msk.msra.mxu1 %vm1942_vm2, %v2589_v15  ;;  %v9015_v33 = vadd.f32 %v3091_v9, %v9010_v57  ;;  %v9018_v24 = vadd.f32 %v3196_v14, %v9010_v57 }
 0x20b   :  { %7500 = vmatprep.subr.mxu0 %v9738_v5  ;;  %7519 = vmatprep.subr.mxu1 %v9738_v5  ;;  %v7343_v56 = vpop.f32.mrf.mxu0  ;;  %v7357_v32 = vpop.f32.mrf.mxu1  ;;  %v2479_v1 = vadd.f32 %v8815_v22, %v8701_v2  ;;  %v2584_v15 = vadd.f32 %v8817_v58, %v8701_v2 }
 0x20c   :  { %9741 = vst [vmem:[#allocation15_spill] sm:$0xff] %v9015_v33  ;;  %9742 = vst [vmem:[#allocation16_spill] sm:$0xff] %v9018_v24  ;;  %v9032_v14 = vadd.f32 %v7343_v56, %v9025_v8  ;;  %v9035_v9 = vadd.f32 %v7357_v32, %v9025_v8  ;;  %v9040_v24 = vld [vmem:[%s9718_s2 + $0x10] sm:$0xff]  ;;  %v9055_v32 = vld [vmem:[%s9718_s2 + $0x28] sm:$0xff] }
 0x20d   :  { %v3101_v33 = vpop.f32.mrf.mxu0  ;;  %v3206_v19 = vpop.f32.mrf.mxu1 }
 0x20e   :  { %9743 = vst [vmem:[#allocation17_spill] sm:$0xff] %v9032_v14  ;;  %9744 = vst [vmem:[#allocation18_spill] sm:$0xff] %v9035_v9  ;;  %7501 = vmatpush3.xpose.msk.msra.mxu0 %vm1942_vm2, %v2479_v1  ;;  %7520 = vmatpush3.xpose.msk.msra.mxu1 %vm1942_vm2, %v2584_v15  ;;  %v9045_v22 = vadd.f32 %v3101_v33, %v9040_v24  ;;  %v9048_v58 = vadd.f32 %v3206_v19, %v9040_v24 }
 0x20f   :  { %7502 = vmatprep.subr.mxu0 %v9738_v5  ;;  %7521 = vmatprep.subr.mxu1 %v9738_v5  ;;  %v7346_v56 = vpop.f32.mrf.mxu0  ;;  %v7360_v9 = vpop.f32.mrf.mxu1  ;;  %v2474_v1 = vadd.f32 %v8823_v10, %v8720_v12  ;;  %v2579_v33 = vadd.f32 %v8825_v11, %v8720_v12 }
 0x210   :  { %9745 = vst [vmem:[#allocation19_spill] sm:$0xff] %v9045_v22  ;;  %9746 = vst [vmem:[#allocation20_spill] sm:$0xff] %v9048_v58  ;;  %v9062_v19 = vadd.f32 %v7346_v56, %v9055_v32  ;;  %v9065_v15 = vadd.f32 %v7360_v9, %v9055_v32  ;;  %v9070_v58 = vld [vmem:[%s9718_s2 + $0x20] sm:$0xff]  ;;  %v9085_v9 = vld [vmem:[%s9718_s2 + $0x38] sm:$0xff] }
 0x211   :  { %v3111_v22 = vpop.f32.mrf.mxu0  ;;  %v3216_v14 = vpop.f32.mrf.mxu1 }
 0x212   :  { %9747 = vst [vmem:[#allocation21_spill] sm:$0xff] %v9062_v19  ;;  %9748 = vst [vmem:[#allocation22_spill] sm:$0xff] %v9065_v15  ;;  %7503 = vmatpush3.xpose.msk.msra.mxu0 %vm1942_vm2, %v2474_v1  ;;  %7522 = vmatpush3.xpose.msk.msra.mxu1 %vm1942_vm2, %v2579_v33  ;;  %v9075_v10 = vadd.f32 %v3111_v22, %v9070_v58  ;;  %v9078_v11 = vadd.f32 %v3216_v14, %v9070_v58 }
 0x213   :  { %7504 = vmatprep.subr.mxu0 %v9738_v5  ;;  %7523 = vmatprep.subr.mxu1 %v9738_v5  ;;  %v7349_v56 = vpop.f32.mrf.mxu0  ;;  %v7363_v15 = vpop.f32.mrf.mxu1  ;;  %v2469_v1 = vadd.f32 %v8792_v31, %v8739_v20  ;;  %v2574_v22 = vadd.f32 %v8794_v42, %v8739_v20 }
 0x214   :  { %9749 = vst [vmem:[#allocation23_spill] sm:$0xff] %v9075_v10  ;;  %9750 = vst [vmem:[#allocation24_spill] sm:$0xff] %v9078_v11  ;;  %v9092_v14 = vadd.f32 %v7349_v56, %v9085_v9  ;;  %v9095_v33 = vadd.f32 %v7363_v15, %v9085_v9  ;;  %v9100_v11 = vld [vmem:[%s9718_s2 + $0x30] sm:$0xff]  ;;  %v81_v15 = vcombine.high %v8765_v38, %v8765_v38 }
 0x215   :  { %v3121_v10 = vpop.f32.mrf.mxu0  ;;  %v3226_v19 = vpop.f32.mrf.mxu1 }
 0x216   :  { %9751 = vst [vmem:[#allocation25_spill] sm:$0xff] %v9095_v33  ;;  %7505 = vmatpush3.xpose.msk.msra.mxu0 %vm1942_vm2, %v2469_v1  ;;  %7524 = vmatpush3.xpose.msk.msra.mxu1 %vm1942_vm2, %v2574_v22  ;;  %v9105_v31 = vadd.f32 %v3121_v10, %v9100_v11  ;;  %v9108_v42 = vadd.f32 %v3226_v19, %v9100_v11 }
 0x217   :  { %7506 = vmatprep.subr.mxu0 %v9738_v5  ;;  %7525 = vmatprep.subr.mxu1 %v9738_v5  ;;  %v7368_v56 = vpop.f32.mrf.mxu0  ;;  %v7382_v33 = vpop.f32.mrf.mxu1  ;;  %v2464_v1 = vadd.f32 %v8805_v49, %v8759_v34  ;;  %v2569_v22 = vadd.f32 %v8807_v50, %v8759_v34  ;;  %v94_v50 = vrot.slane %v81_v15, %v8345_v13 }
 0x218   :  { %9752 = vst [vmem:[#allocation26_spill] sm:$0xff] %v9105_v31  ;;  %9753 = vst [vmem:[#allocation27_spill] sm:$0xff] %v9108_v42  ;;  %v9119_v10 = vadd.f32 %v7368_v56, %v8993_v25  ;;  %v9122_v19 = vadd.f32 %v7382_v33, %v8993_v25 }
 0x219   :  { %v3301_v42 = vpop.f32.mrf.mxu0  ;;  %v3406_v38 = vpop.f32.mrf.mxu1 }
 0x21a   :  { %9754 = vst [vmem:[#allocation28_spill] sm:$0xff] %v9122_v19  ;;  %7507 = vmatpush3.xpose.msk.msra.mxu0 %vm1942_vm2, %v2464_v1  ;;  %7526 = vmatpush3.xpose.msk.msra.mxu1 %vm1942_vm2, %v2569_v22  ;;  %v9127_v31 = vadd.f32 %v3301_v42, %v9010_v57  ;;  %v9130_v49 = vadd.f32 %v3406_v38, %v9010_v57 }
 0x21b   :  { %7508 = vmatprep.subr.mxu0 %v9738_v5  ;;  %7527 = vmatprep.subr.mxu1 %v9738_v5  ;;  %v7371_v33 = vpop.f32.mrf.mxu0  ;;  %v7385_v56 = vpop.f32.mrf.mxu1  ;;  %v2459_v19 = vadd.f32 %v8769_v39, %v8780_v28  ;;  %v2564_v1 = vadd.f32 %v8771_v40, %v8780_v28  ;;  %v457_v40 = vadd.f32 %v8331_v60, %v94_v50 }
 0x21c   :  { %9755 = vst [vmem:[#allocation29_spill] sm:$0xff] %v9127_v31  ;;  %9756 = vst [vmem:[#allocation30_spill] sm:$0xff] %v9130_v49  ;;  %v9140_v42 = vadd.f32 %v7371_v33, %v9025_v8  ;;  %v9143_v22 = vadd.f32 %v7385_v56, %v9025_v8  ;;  %v527_v33 = vadd.f32 %v8333_v61, %v94_v50 }
 0x21d   :  { %v3311_v38 = vpop.f32.mrf.mxu0  ;;  %v3416_v15 = vpop.f32.mrf.mxu1  ;;  %v2699_v60 = vadd.f32 %v8899_v41, %v8679_v46 }
 0x21e   :  { %9757 = vst [vmem:[#allocation31_spill] sm:$0xff] %v9143_v22  ;;  %7509 = vmatpush3.xpose.msk.msra.mxu0 %vm1942_vm2, %v2459_v19  ;;  %7528 = vmatpush3.xpose.msk.msra.mxu1 %vm1942_vm2, %v2564_v1  ;;  %v9148_v49 = vadd.f32 %v3311_v38, %v9040_v24  ;;  %v9151_v39 = vadd.f32 %v3416_v15, %v9040_v24 }
 0x21f   :  { %7510 = vmatprep.subr.mxu0 %v9738_v5  ;;  %7529 = vmatprep.subr.mxu1 %v9738_v5  ;;  %v7374_v56 = vpop.f32.mrf.mxu0  ;;  %v7388_v31 = vpop.f32.mrf.mxu1  ;;  %v2454_v19 = vadd.f32 %v8782_v37, %v8803_v48  ;;  %v2559_v1 = vadd.f32 %v8784_v43, %v8803_v48  ;;  %v2804_v37 = vadd.f32 %v8901_v21, %v8679_v46 }
 0x220   :  { %9758 = vst [vmem:[#allocation32_spill] sm:$0xff] %v9151_v39  ;;  %v9162_v38 = vadd.f32 %v7374_v56, %v9055_v32  ;;  %v9165_v15 = vadd.f32 %v7388_v31, %v9055_v32  ;;  %v1922_v31 = vmul.f32 0.35355338, %v457_v40  ;;  %v1923_v39 = vmul.f32 0.35355338, %v527_v33 }
 0x221   :  { %v3321_v61 = vpop.f32.mrf.mxu0  ;;  %v3426_v50 = vpop.f32.mrf.mxu1 }
 0x222   :  { %7511 = vmatpush3.xpose.msk.msra.mxu0 %vm1942_vm2, %v2454_v19  ;;  %7530 = vmatpush3.xpose.msk.msra.mxu1 %vm1942_vm2, %v2559_v1  ;;  %v9174_v43 = vadd.f32 %v3321_v61, %v9070_v58  ;;  %v9177_v56 = vadd.f32 %v3426_v50, %v9070_v58 }
 0x223   :  { %7534 = vmatprep.subr.mxu0 %v9738_v5  ;;  %7553 = vmatprep.subr.mxu1 %v9738_v5  ;;  %v7377_v41 = vpop.f32.mrf.mxu0  ;;  %v7391_v22 = vpop.f32.mrf.mxu1 }
 0x224   :  { %v9182_v19 = vadd.f32 %v7377_v41, %v9085_v9  ;;  %v9185_v1 = vadd.f32 %v7391_v22, %v9085_v9  ;;  %v2694_v22 = vadd.f32 %v8907_v47, %v8686_v55 }
 0x225   :  { %7513 = vmatmul.mubr.msk.f32.vlgmr.msra.gmra.mxu0 %vm1942_vm2, %v1922_v31  ;;  %7532 = vmatmul.mubr.msk.f32.vlgmr.msra.gmra.mxu1 %vm1942_vm2, %v1923_v39  ;;  %v3331_v46 = vpop.f32.mrf.mxu0  ;;  %v3436_v21 = vpop.f32.mrf.mxu1 }
 0x226   :  { %7535 = vmatpush3.xpose.msk.msra.mxu0 %vm1942_vm2, %v2699_v60  ;;  %7554 = vmatpush3.xpose.msk.msra.mxu1 %vm1942_vm2, %v2804_v37  ;;  %v9192_v40 = vadd.f32 %v3331_v46, %v9100_v11  ;;  %v9195_v33 = vadd.f32 %v3436_v21, %v9100_v11  ;;  %v2799_v60 = vadd.f32 %v8909_v54, %v8686_v55 }
 0x227   :  { %7536 = vmatprep.subr.mxu0 %v9738_v5  ;;  %7555 = vmatprep.subr.mxu1 %v9738_v5  ;;  %v7396_v39 = vpop.f32.mrf.mxu0  ;;  %v7410_v61 = vpop.f32.mrf.mxu1  ;;  %v2689_v21 = vadd.f32 %v8881_v0, %v8701_v2 }
 0x228   :  { %7550 = vmatprep.mubr.msk.f32.mxu0 %vm7903_vm1, %v9738_v5  ;;  %7569 = vmatprep.mubr.msk.f32.mxu1 %vm7903_vm1, %v9738_v5  ;;  %v9208_v50 = vadd.f32 %v7396_v39, %v8993_v25  ;;  %v9211_v47 = vadd.f32 %v7410_v61, %v8993_v25 }
 0x229   :  { %v3511_v37 = vpop.f32.mrf.mxu0  ;;  %v3616_v31 = vpop.f32.mrf.mxu1 }
 0x22a   :  { %7537 = vmatpush3.xpose.msk.msra.mxu0 %vm1942_vm2, %v2694_v22  ;;  %7556 = vmatpush3.xpose.msk.msra.mxu1 %vm1942_vm2, %v2799_v60  ;;  %v9216_v55 = vadd.f32 %v3511_v37, %v9010_v57  ;;  %v9219_v54 = vadd.f32 %v3616_v31, %v9010_v57  ;;  %v2794_v22 = vadd.f32 %v8883_v52, %v8701_v2 }
 0x22b   :  { %7538 = vmatprep.subr.mxu0 %v9738_v5  ;;  %7557 = vmatprep.subr.mxu1 %v9738_v5  ;;  %v7399_v41 = vpop.f32.mrf.mxu0  ;;  %v7413_v46 = vpop.f32.mrf.mxu1 }
 0x22c   :  { %9759 = vst [vmem:[#allocation33_spill] sm:$0xff] %v9216_v55  ;;  %v9228_v39 = vadd.f32 %v7399_v41, %v9025_v8  ;;  %v9231_v61 = vadd.f32 %v7413_v46, %v9025_v8  ;;  %v2684_v41 = vadd.f32 %v8889_v53, %v8720_v12  ;;  %v2789_v46 = vadd.f32 %v8891_v18, %v8720_v12 }
 0x22d   :  { %v3521_v60 = vpop.f32.mrf.mxu0  ;;  %v3626_v37 = vpop.f32.mrf.mxu1 }
 0x22e   :  { %7539 = vmatpush3.xpose.msk.msra.mxu0 %vm1942_vm2, %v2689_v21  ;;  %7558 = vmatpush3.xpose.msk.msra.mxu1 %vm1942_vm2, %v2794_v22  ;;  %v9236_v31 = vadd.f32 %v3521_v60, %v9040_v24  ;;  %v9239_v0 = vadd.f32 %v3626_v37, %v9040_v24 }
 0x22f   :  { %7540 = vmatprep.subr.mxu0 %v9738_v5  ;;  %7559 = vmatprep.subr.mxu1 %v9738_v5  ;;  %v7402_v2 = vpop.f32.mrf.mxu0  ;;  %v7416_v52 = vpop.f32.mrf.mxu1 }
 0x230   :  { %v9248_v21 = vadd.f32 %v7402_v2, %v9055_v32  ;;  %v9251_v22 = vadd.f32 %v7416_v52, %v9055_v32  ;;  %v2679_v2 = vadd.f32 %v8865_v35, %v8739_v20  ;;  %v2784_v52 = vadd.f32 %v8867_v36, %v8739_v20 }
 0x231   :  { %v3531_v60 = vpop.f32.mrf.mxu0  ;;  %v3636_v37 = vpop.f32.mrf.mxu1  ;;  %v2674_v20 = vadd.f32 %v8873_v51, %v8759_v34  ;;  %v2779_v35 = vadd.f32 %v8875_v63, %v8759_v34  ;;  %v3012_v63 = vadd.f32 %v8956_v16, %v9055_v32  ;;  %v9760_v16 = vld [vmem:[#allocation9_spill] sm:$0xff] }
 0x232   :  { %7541 = vmatpush3.xpose.msk.msra.mxu0 %vm1942_vm2, %v2684_v41  ;;  %7560 = vmatpush3.xpose.msk.msra.mxu1 %vm1942_vm2, %v2789_v46  ;;  %v9256_v55 = vadd.f32 %v3531_v60, %v9070_v58  ;;  %v9259_v53 = vadd.f32 %v3636_v37, %v9070_v58  ;;  %v82_v60 = vcombine.high %v8914_v30, %v8914_v30 }
 0x233   :  { %7542 = vmatprep.subr.mxu0 %v9738_v5  ;;  %7561 = vmatprep.subr.mxu1 %v9738_v5  ;;  %v7405_v12 = vpop.f32.mrf.mxu0  ;;  %v7419_v18 = vpop.f32.mrf.mxu1  ;;  %v2669_v30 = vadd.f32 %v8847_v27, %v8780_v28  ;;  %v2774_v37 = vadd.f32 %v8849_v29, %v8780_v28  ;;  %v2769_v27 = vadd.f32 %v8859_v45, %v8803_v48 }
 0x234   :  { %v9268_v41 = vadd.f32 %v7405_v12, %v9085_v9  ;;  %v9271_v46 = vadd.f32 %v7419_v18, %v9085_v9  ;;  %v98_v36 = vrot.slane %v82_v60, %v8345_v13  ;;  %v2664_v13 = vadd.f32 %v8857_v44, %v8803_v48  ;;  %v9765_v12 = vld [vmem:[#allocation6_spill] sm:$0xff] }
 0x235   :  { %v2917_v28 = vadd.f32 %v8974_v3, %v9085_v9  ;;  %v2912_v44 = vadd.f32 %v8980_v62, %v9100_v11  ;;  %v3017_v48 = vadd.f32 %v8982_v23, %v9100_v11  ;;  %v2907_v45 = vadd.f32 %v8954_v59, %v9055_v32  ;;  %v9761_v62 = vld [vmem:[#allocation10_spill] sm:$0xff] }
 0x236   :  { %7543 = vmatpush3.xpose.msk.msra.mxu0 %vm1942_vm2, %v2679_v2  ;;  %7562 = vmatpush3.xpose.msk.msra.mxu1 %vm1942_vm2, %v2784_v52  ;;  %v597_v34 = vadd.f32 %v8335_v6, %v98_v36  ;;  %v667_v51 = vadd.f32 %v8337_v7, %v98_v36  ;;  %v3022_v6 = vadd.f32 %v8976_v4, %v9085_v9  ;;  %v9767_v52 = vld [vmem:[#allocation8_spill] sm:$0xff] }
 0x237   :  { %7544 = vmatprep.subr.mxu0 %v9738_v5  ;;  %7563 = vmatprep.subr.mxu1 %v9738_v5  ;;  %v2902_v3 = vadd.f32 %v8962_v17, %v9070_v58  ;;  %v3007_v4 = vadd.f32 %v8964_v26, %v9070_v58  ;;  %v2897_v59 = vadd.f32 %v9760_v16, %v9025_v8  ;;  %v9762_v17 = vld [vmem:[#allocation11_spill] sm:$0xff]  ;;  %v9763_v58 = vld [vmem:[#allocation12_spill] sm:$0xff] }
 0x238   :  { %v1924_v7 = vmul.f32 0.35355338, %v597_v34  ;;  %v1925_v29 = vmul.f32 0.35355338, %v667_v51  ;;  %v3002_v23 = vadd.f32 %v9761_v62, %v9025_v8  ;;  %v2892_v26 = vadd.f32 %v9762_v17, %v9040_v24  ;;  %v9764_v8 = vld [vmem:[#allocation5_spill] sm:$0xff]  ;;  %v3656_v36 = vld [vmem:[%s9719_s3 + $0x8] sm:$0xff] }
 0x239   :  { %v2997_v32 = vadd.f32 %v9763_v58, %v9040_v24  ;;  %v2887_v9 = vadd.f32 %v9764_v8, %v8993_v25  ;;  %v2992_v18 = vadd.f32 %v9765_v12, %v8993_v25  ;;  %v9766_v24 = vld [vmem:[#allocation7_spill] sm:$0xff]  ;;  %v2987_v60 = vadd.f32 %v9767_v52, %v9010_v57  ;;  %v9360_v25 = vpop.f32.mrf.mxu0  ;;  %v3660_v62 = vld [vmem:[%s9719_s3 + $0x28] sm:$0xff] }
 0x23a   :  { %7545 = vmatpush3.xpose.msk.msra.mxu0 %vm1942_vm2, %v2674_v20  ;;  %7564 = vmatpush3.xpose.msk.msra.mxu1 %vm1942_vm2, %v2779_v35  ;;  %v2882_v2 = vadd.f32 %v9766_v24, %v9010_v57  ;;  %v9362_v57 = vpop.f32.mrf.mxu1  ;;  %v3655_v20 = vld [vmem:[%s9719_s3] sm:$0xff]  ;;  %v3662_v24 = vld [vmem:[%s9719_s3 + $0x38] sm:$0xff] }
 0x23b   :  { %7546 = vmatprep.subr.mxu0 %v9738_v5  ;;  %7565 = vmatprep.subr.mxu1 %v9738_v5 }
 0x23e   :  { %7547 = vmatpush3.xpose.msk.msra.mxu0 %vm1942_vm2, %v2669_v30  ;;  %7566 = vmatpush3.xpose.msk.msra.mxu1 %vm1942_vm2, %v2774_v37 }
 0x23f   :  { %7548 = vmatprep.subr.mxu0 %v9738_v5  ;;  %7567 = vmatprep.subr.mxu1 %v9738_v5 }
 0x242   :  { %7549 = vmatpush3.xpose.msk.msra.mxu0 %vm1942_vm2, %v2664_v13  ;;  %7568 = vmatpush3.xpose.msk.msra.mxu1 %vm1942_vm2, %v2769_v27 }
 0x243   :  { %7572 = vmatprep.subr.mxu0 %v9738_v5  ;;  %7591 = vmatprep.subr.mxu1 %v9738_v5 }
 0x245   :  { %7551 = vmatmul.mubr.msk.f32.vlgmr.msra.gmra.mxu0 %vm1942_vm2, %v1924_v7  ;;  %7570 = vmatmul.mubr.msk.f32.vlgmr.msra.gmra.mxu1 %vm1942_vm2, %v1925_v29  ;;  %v3658_v29 = vld [vmem:[%s9719_s3 + $0x18] sm:$0xff] }
 0x246   :  { %7573 = vmatpush3.msra.mxu0 %v2917_v28  ;;  %7592 = vmatpush3.msra.mxu1 %v3022_v6  ;;  %v3657_v6 = vld [vmem:[%s9719_s3 + $0x10] sm:$0xff] }
 0x247   :  { %7574 = vmatprep.subr.mxu0 %v9738_v5  ;;  %7593 = vmatprep.subr.mxu1 %v9738_v5 }
 0x248   :  { %7575 = vmatpush3.msra.mxu0 %v2912_v44  ;;  %7594 = vmatpush3.msra.mxu1 %v3017_v48 }
 0x249   :  { %7576 = vmatprep.subr.mxu0 %v9738_v5  ;;  %7595 = vmatprep.subr.mxu1 %v9738_v5 }
 0x24a   :  { %7577 = vmatpush3.msra.mxu0 %v2907_v45  ;;  %7596 = vmatpush3.msra.mxu1 %v3012_v63 }
 0x24b   :  { %7578 = vmatprep.subr.mxu0 %v9738_v5  ;;  %7597 = vmatprep.subr.mxu1 %v9738_v5 }
 0x24c   :  { %7579 = vmatpush3.msra.mxu0 %v2902_v3  ;;  %7598 = vmatpush3.msra.mxu1 %v3007_v4 }
 0x24d   :  { %7580 = vmatprep.subr.mxu0 %v9738_v5  ;;  %7599 = vmatprep.subr.mxu1 %v9738_v5 }
 0x24e   :  { %7581 = vmatpush3.msra.mxu0 %v2897_v59  ;;  %7600 = vmatpush3.msra.mxu1 %v3002_v23  ;;  %v3659_v59 = vld [vmem:[%s9719_s3 + $0x20] sm:$0xff] }
 0x24f   :  { %7582 = vmatprep.subr.mxu0 %v9738_v5  ;;  %7601 = vmatprep.subr.mxu1 %v9738_v5 }
 0x250   :  { %7583 = vmatpush3.msra.mxu0 %v2892_v26  ;;  %7602 = vmatpush3.msra.mxu1 %v2997_v32 }
 0x251   :  { %7584 = vmatprep.subr.mxu0 %v9738_v5  ;;  %7603 = vmatprep.subr.mxu1 %v9738_v5 }
 0x252   :  { %7585 = vmatpush3.msra.mxu0 %v2887_v9  ;;  %7604 = vmatpush3.msra.mxu1 %v2992_v18  ;;  %v3661_v18 = vld [vmem:[%s9719_s3 + $0x30] sm:$0xff] }
 0x253   :  { %7586 = vmatprep.subr.mxu0 %v9738_v5  ;;  %7605 = vmatprep.subr.mxu1 %v9738_v5 }
 0x254   :  { %7587 = vmatpush3.msra.mxu0 %v2882_v2  ;;  %7606 = vmatpush3.msra.mxu1 %v2987_v60 }
 0x255   :  { %7588 = vmatprep.mubr.msk.f32.mxu0 %vm7903_vm1, %v9738_v5  ;;  %7610 = vmatprep.subr.mxu0 %v9738_v5 }
 0x256   :  { %7607 = vmatprep.mubr.msk.f32.mxu1 %vm7903_vm1, %v9738_v5  ;;  %7629 = vmatprep.subr.mxu1 %v9738_v5 }
 0x2a5   :  { %v3756_v35 = vpop.f32.mrf.mxu0  ;;  %v3853_v30 = vpop.f32.mrf.mxu1 }
 0x2a6   :  { %v3757_v37 = vadd.f32 %v3756_v35, %v3655_v20  ;;  %v3854_v13 = vadd.f32 %v3853_v30, %v3656_v36 }
 0x2a7   :  { %v7438_v34 = vpop.f32.mrf.mxu0  ;;  %v7457_v51 = vpop.f32.mrf.mxu1 }
 0x2a8   :  { %v4440_v27 = vsel %vm4439_vm3, %v3757_v37, -inf  ;;  %v4443_v28 = vsel %vm4439_vm3, %v3854_v13, -inf }
 0x2a9   :  { %4441 = vmax.xlane.f32.xlu0 %v4440_v27 }
 0x2ad   :  { %4444 = vmax.xlane.f32.xlu0 %v4443_v28 }
 0x2c5   :  { %v3950_v7 = vpop.f32.mrf.mxu0  ;;  %v4047_v44 = vpop.f32.mrf.mxu1 }
 0x2c6   :  { %v3951_v48 = vadd.f32 %v3950_v7, %v3657_v6  ;;  %v4048_v3 = vadd.f32 %v4047_v44, %v3658_v29 }
 0x2c7   :  { %v7476_v45 = vpop.f32.mrf.mxu0  ;;  %v7495_v63 = vpop.f32.mrf.mxu1 }
 0x2c8   :  { %v4446_v4 = vsel %vm4439_vm3, %v3951_v48, -inf  ;;  %v4449_v16 = vsel %vm4439_vm3, %v4048_v3, -inf }
 0x2c9   :  { %4447 = vmax.xlane.f32.xlu1 %v4446_v4 }
 0x2cd   :  { %4450 = vmax.xlane.f32.xlu1 %v4449_v16 }
 0x2e5   :  { %v4144_v23 = vpop.f32.mrf.mxu0  ;;  %v4241_v17 = vpop.f32.mrf.mxu1 }
 0x2e6   :  { %v4145_v26 = vadd.f32 %v4144_v23, %v3659_v59  ;;  %v4242_v58 = vadd.f32 %v4241_v17, %v3660_v62 }
 0x2e7   :  { %v7514_v32 = vpop.f32.mrf.mxu0  ;;  %v7533_v8 = vpop.f32.mrf.mxu1 }
 0x2e8   :  { %v4455_v9 = vsel %vm4439_vm3, %v4242_v58, -inf  ;;  %v4452_v12 = vsel %vm4439_vm3, %v4145_v26, -inf }
 0x2e9   :  { %4456 = vmax.xlane.f32.xlu1 %v4455_v9  ;;  %4453 = vmax.xlane.f32.xlu0 %v4452_v12 }
 0x305   :  { %v4338_v2 = vpop.f32.mrf.mxu0  ;;  %v4435_v52 = vpop.f32.mrf.mxu1 }
 0x306   :  { %v4339_v60 = vadd.f32 %v4338_v2, %v3661_v18  ;;  %v4436_v20 = vadd.f32 %v4435_v52, %v3662_v24 }
 0x307   :  { %v7552_v35 = vpop.f32.mrf.mxu0  ;;  %v7571_v36 = vpop.f32.mrf.mxu1 }
 0x308   :  { %v4461_v30 = vsel %vm4439_vm3, %v4436_v20, -inf  ;;  %v4458_v34 = vsel %vm4439_vm3, %v4339_v60, -inf }
 0x309   :  { %4462 = vmax.xlane.f32.xlu1 %v4461_v30  ;;  %4459 = vmax.xlane.f32.xlu0 %v4458_v34 }
 0x332   :  { %v4442_v51 = vpop.xlane.xlu0 %4441 }
 0x333   :  { %v4464_v27 = vsub.f32 %v3757_v37, %v4442_v51 }
 0x335   :  { %v4472_v28 = vmul.f32 1.442695, %v4464_v27 }
 0x336   :  { %v4445_v6 = vpop.xlane.xlu0 %4444 }
 0x337   :  { %7830 = vpow2.f32 %v4472_v28  ;;  %v4465_v7 = vsub.f32 %v3854_v13, %v4445_v6 }
 0x339   :  { %v4474_v29 = vmul.f32 1.442695, %v4465_v7 }
 0x33b   :  { %7832 = vpow2.f32 %v4474_v29 }
 0x344   :  { %v7831_v44 = vpop.eup %7830 }
 0x345   :  { %v4488_v45 = vsel %vm4439_vm3, %v7831_v44, 0.0 }
 0x346   :  { %4489 = vadd.xlane.f32.xlu0 %v4488_v45 }
 0x348   :  { %v7833_v63 = vpop.eup %7832 }
 0x349   :  { %v4491_v4 = vsel %vm4439_vm3, %v7833_v63, 0.0 }
 0x34a   :  { %4492 = vadd.xlane.f32.xlu1 %v4491_v4 }
 0x352   :  { %v4448_v16 = vpop.xlane.xlu1 %4447 }
 0x353   :  { %v4466_v59 = vsub.f32 %v3951_v48, %v4448_v16 }
 0x355   :  { %v4476_v62 = vmul.f32 1.442695, %v4466_v59 }
 0x356   :  { %v4451_v23 = vpop.xlane.xlu1 %4450 }
 0x357   :  { %7834 = vpow2.f32 %v4476_v62  ;;  %v4467_v37 = vsub.f32 %v4048_v3, %v4451_v23  ;;  %v9768_v23 = vld [vmem:[#allocation26_spill] sm:$0xff] }
 0x359   :  { %v4478_v17 = vmul.f32 1.442695, %v4467_v37  ;;  %v9769_v37 = vld [vmem:[#allocation21_spill] sm:$0xff] }
 0x35b   :  { %7836 = vpow2.f32 %v4478_v17  ;;  %v9772_v17 = vld [vmem:[#allocation27_spill] sm:$0xff] }
 0x364   :  { %v9398_v32 = vpop.eup %7834 }
 0x365   :  { %v4494_v13 = vsel %vm4439_vm3, %v9398_v32, 0.0 }
 0x366   :  { %4495 = vadd.xlane.f32.xlu0 %v4494_v13  ;;  %v9774_v13 = vld [vmem:[#allocation22_spill] sm:$0xff] }
 0x368   :  { %v9402_v8 = vpop.eup %7836 }
 0x369   :  { %v4497_v9 = vsel %vm4439_vm3, %v9402_v8, 0.0 }
 0x36a   :  { %4498 = vadd.xlane.f32.xlu1 %v4497_v9  ;;  %v9775_v9 = vld [vmem:[#allocation19_spill] sm:$0xff] }
 0x372   :  { %v4457_v12 = vpop.xlane.xlu1 %4456  ;;  %v4454_v48 = vpop.xlane.xlu0 %4453 }
 0x373   :  { %v4469_v18 = vsub.f32 %v4242_v58, %v4457_v12  ;;  %v4468_v24 = vsub.f32 %v4145_v26, %v4454_v48  ;;  %v9776_v12 = vld [vmem:[#allocation24_spill] sm:$0xff]  ;;  %v9777_v48 = vld [vmem:[#allocation13_spill] sm:$0xff] }
 0x375   :  { %v4482_v2 = vmul.f32 1.442695, %v4469_v18  ;;  %v4480_v3 = vmul.f32 1.442695, %v4468_v24  ;;  %v9778_v18 = vld [vmem:[#allocation18_spill] sm:$0xff]  ;;  %v9779_v24 = vld [vmem:[#allocation15_spill] sm:$0xff] }
 0x377   :  { %7838 = vpow2.f32 %v4482_v2  ;;  %v9780_v2 = vld [vmem:[#allocation20_spill] sm:$0xff] }
 0x378   :  { %7840 = vpow2.f32 %v4480_v3 }
 0x384   :  { %v9406_v52 = vpop.eup %7838 }
 0x385   :  { %v9408_v35 = vpop.eup %7840  ;;  %v4503_v36 = vsel %vm4439_vm3, %v9406_v52, 0.0 }
 0x386   :  { %4504 = vadd.xlane.f32.xlu1 %v4503_v36  ;;  %v4500_v30 = vsel %vm4439_vm3, %v9408_v35, 0.0  ;;  %v9781_v36 = vld [vmem:[#allocation14_spill] sm:$0xff] }
 0x387   :  { %4501 = vadd.xlane.f32.xlu0 %v4500_v30  ;;  %v9782_v30 = vld [vmem:[#allocation16_spill] sm:$0xff] }
 0x392   :  { %v4463_v34 = vpop.xlane.xlu1 %4462  ;;  %v4460_v51 = vpop.xlane.xlu0 %4459 }
 0x393   :  { %v4471_v58 = vsub.f32 %v4436_v20, %v4463_v34  ;;  %v4470_v26 = vsub.f32 %v4339_v60, %v4460_v51 }
 0x395   :  { %v4486_v27 = vmul.f32 1.442695, %v4471_v58  ;;  %v4484_v28 = vmul.f32 1.442695, %v4470_v26 }
 0x397   :  { %7842 = vpow2.f32 %v4486_v27 }
 0x398   :  { %7844 = vpow2.f32 %v4484_v28  ;;  %v5115_v28 = vld [vmem:[%s9723_s7 + $0x18] sm:$0xff] }
 0x3a4   :  { %v9414_v6 = vpop.eup %7842 }
 0x3a5   :  { %v9416_v7 = vpop.eup %7844  ;;  %v4509_v29 = vsel %vm4439_vm3, %v9414_v6, 0.0 }
 0x3a6   :  { %4510 = vadd.xlane.f32.xlu1 %v4509_v29  ;;  %v4506_v45 = vsel %vm4439_vm3, %v9416_v7, 0.0 }
 0x3a7   :  { %4507 = vadd.xlane.f32.xlu0 %v4506_v45 }
 0x3cf   :  { %v4490_v4 = vpop.xlane.xlu0 %4489 }
 0x3d0   :  { %7846 = vrcp.f32 %v4490_v4 }
 0x3d3   :  { %v4493_v20 = vpop.xlane.xlu1 %4492 }
 0x3d4   :  { %7848 = vrcp.f32 %v4493_v20 }
 0x3dd   :  { %v7847_v60 = vpop.eup %7846 }
 0x3de   :  { %v4520_v16 = vmul.f32 %v7847_v60, %v7831_v44  ;;  %v9770_v44 = vld [vmem:[#allocation25_spill] sm:$0xff] }
 0x3e0   :  { %7589 = vmatmul.mubr.msk.f32.vlgmr.msra.gmra.mxu0 %vm4439_vm3, %v4520_v16 }
 0x3e1   :  { %v7849_v59 = vpop.eup %7848  ;;  %7611 = vmatpush3.msra.mxu0 %v9092_v14  ;;  %7626 = vmatprep.mubr.msk.f32.mxu0 %vm7903_vm1, %v9738_v5  ;;  %v9771_v14 = vld [vmem:[#allocation23_spill] sm:$0xff] }
 0x3e2   :  { %7612 = vmatprep.subr.mxu0 %v9738_v5  ;;  %v4521_v62 = vmul.f32 %v7849_v59, %v7833_v63  ;;  %v9773_v63 = vld [vmem:[#allocation17_spill] sm:$0xff] }
 0x3e3   :  { %7613 = vmatpush3.msra.mxu0 %v9768_v23 }
 0x3e4   :  { %7614 = vmatprep.subr.mxu0 %v9738_v5  ;;  %7608 = vmatmul.mubr.msk.f32.vlgmr.msra.gmra.mxu1 %vm4439_vm3, %v4521_v62 }
 0x3e5   :  { %7615 = vmatpush3.msra.mxu0 %v9769_v37  ;;  %7630 = vmatpush3.msra.mxu1 %v9770_v44 }
 0x3e6   :  { %7616 = vmatprep.subr.mxu0 %v9738_v5  ;;  %7631 = vmatprep.subr.mxu1 %v9738_v5 }
 0x3e7   :  { %7617 = vmatpush3.msra.mxu0 %v9771_v14  ;;  %7632 = vmatpush3.msra.mxu1 %v9772_v17 }
 0x3e8   :  { %7618 = vmatprep.subr.mxu0 %v9738_v5  ;;  %7633 = vmatprep.subr.mxu1 %v9738_v5 }
 0x3e9   :  { %7619 = vmatpush3.msra.mxu0 %v9773_v63  ;;  %7634 = vmatpush3.msra.mxu1 %v9774_v13 }
 0x3ea   :  { %7620 = vmatprep.subr.mxu0 %v9738_v5  ;;  %7635 = vmatprep.subr.mxu1 %v9738_v5 }
 0x3eb   :  { %7621 = vmatpush3.msra.mxu0 %v9775_v9  ;;  %7636 = vmatpush3.msra.mxu1 %v9776_v12 }
 0x3ec   :  { %7622 = vmatprep.subr.mxu0 %v9738_v5  ;;  %7637 = vmatprep.subr.mxu1 %v9738_v5 }
 0x3ed   :  { %7623 = vmatpush3.msra.mxu0 %v9777_v48  ;;  %7638 = vmatpush3.msra.mxu1 %v9778_v18 }
 0x3ee   :  { %7624 = vmatprep.subr.mxu0 %v9738_v5  ;;  %7639 = vmatprep.subr.mxu1 %v9738_v5 }
 0x3ef   :  { %7625 = vmatpush3.msra.mxu0 %v9779_v24  ;;  %7640 = vmatpush3.msra.mxu1 %v9780_v2  ;;  %v4496_v3 = vpop.xlane.xlu0 %4495 }
 0x3f0   :  { %7641 = vmatprep.subr.mxu1 %v9738_v5  ;;  %7850 = vrcp.f32 %v4496_v3  ;;  %7648 = vmatprep.subr.mxu0 %v9738_v5 }
 0x3f1   :  { %7642 = vmatpush3.msra.mxu1 %v9781_v36  ;;  %7645 = vmatprep.mubr.msk.f32.mxu1 %vm7903_vm1, %v9738_v5 }
 0x3f2   :  { %7643 = vmatprep.subr.mxu1 %v9738_v5 }
 0x3f3   :  { %7644 = vmatpush3.msra.mxu1 %v9782_v30  ;;  %v4499_v34 = vpop.xlane.xlu1 %4498 }
 0x3f4   :  { %7852 = vrcp.f32 %v4499_v34  ;;  %7667 = vmatprep.subr.mxu1 %v9738_v5 }
 0x3fd   :  { %v7851_v51 = vpop.eup %7850 }
 0x3fe   :  { %v4522_v58 = vmul.f32 %v7851_v51, %v9398_v32  ;;  %v3647_v32 = vadd.f32 %v9362_v57, %v9100_v11 }
 0x400   :  { %7627 = vmatmul.mubr.msk.f32.vlgmr.msra.gmra.mxu0 %vm4439_vm3, %v4522_v58 }
 0x401   :  { %v7853_v26 = vpop.eup %7852  ;;  %7649 = vmatpush3.msra.mxu0 %v9182_v19  ;;  %7664 = vmatprep.mubr.msk.f32.mxu0 %vm7903_vm1, %v9738_v5 }
 0x402   :  { %7650 = vmatprep.subr.mxu0 %v9738_v5  ;;  %v4523_v27 = vmul.f32 %v7853_v26, %v9402_v8  ;;  %v3542_v8 = vadd.f32 %v9360_v25, %v9100_v11 }
 0x403   :  { %7651 = vmatpush3.msra.mxu0 %v9192_v40 }
 0x404   :  { %7652 = vmatprep.subr.mxu0 %v9738_v5  ;;  %7646 = vmatmul.mubr.msk.f32.vlgmr.msra.gmra.mxu1 %vm4439_vm3, %v4523_v27 }
 0x405   :  { %7653 = vmatpush3.msra.mxu0 %v9162_v38  ;;  %7668 = vmatpush3.msra.mxu1 %v9185_v1  ;;  %v9783_v38 = vld [vmem:[#allocation31_spill] sm:$0xff] }
 0x406   :  { %7654 = vmatprep.subr.mxu0 %v9738_v5  ;;  %7669 = vmatprep.subr.mxu1 %v9738_v5 }
 0x407   :  { %7655 = vmatpush3.msra.mxu0 %v9174_v43  ;;  %7670 = vmatpush3.msra.mxu1 %v9195_v33 }
 0x408   :  { %7656 = vmatprep.subr.mxu0 %v9738_v5  ;;  %7671 = vmatprep.subr.mxu1 %v9738_v5 }
 0x409   :  { %7657 = vmatpush3.msra.mxu0 %v9140_v42  ;;  %7672 = vmatpush3.msra.mxu1 %v9165_v15  ;;  %v9784_v42 = vld [vmem:[#allocation29_spill] sm:$0xff]  ;;  %v9785_v15 = vld [vmem:[#allocation32_spill] sm:$0xff] }
 0x40a   :  { %7658 = vmatprep.subr.mxu0 %v9738_v5  ;;  %7673 = vmatprep.subr.mxu1 %v9738_v5 }
 0x40b   :  { %7659 = vmatpush3.msra.mxu0 %v9148_v49  ;;  %7674 = vmatpush3.msra.mxu1 %v9177_v56  ;;  %v9787_v56 = vld [vmem:[#allocation30_spill] sm:$0xff] }
 0x40c   :  { %7660 = vmatprep.subr.mxu0 %v9738_v5  ;;  %7675 = vmatprep.subr.mxu1 %v9738_v5 }
 0x40d   :  { %7661 = vmatpush3.msra.mxu0 %v9119_v10  ;;  %7676 = vmatpush3.msra.mxu1 %v9783_v38  ;;  %v9786_v10 = vld [vmem:[#allocation28_spill] sm:$0xff] }
 0x40e   :  { %7662 = vmatprep.subr.mxu0 %v9738_v5  ;;  %7677 = vmatprep.subr.mxu1 %v9738_v5 }
 0x40f   :  { %7663 = vmatpush3.msra.mxu0 %v9784_v42  ;;  %7678 = vmatpush3.msra.mxu1 %v9785_v15  ;;  %v4505_v43 = vpop.xlane.xlu1 %4504  ;;  %v6469_v42 = vld [vmem:[%s9726_s10] ss:$0 sm:$0xff] }
 0x410   :  { %7679 = vmatprep.subr.mxu1 %v9738_v5  ;;  %7854 = vrcp.f32 %v4505_v43  ;;  %v4502_v49 = vpop.xlane.xlu0 %4501  ;;  %7683 = vmatprep.mubr.msk.f32.mxu1 %vm7903_vm1, %v9738_v5 }
 0x411   :  { %7856 = vrcp.f32 %v4502_v49  ;;  %7680 = vmatpush3.msra.mxu1 %v9786_v10  ;;  %7686 = vmatprep.subr.mxu0 %v9738_v5 }
 0x412   :  { %7681 = vmatprep.subr.mxu1 %v9738_v5 }
 0x413   :  { %7682 = vmatpush3.msra.mxu1 %v9787_v56 }
 0x414   :  { %7705 = vmatprep.subr.mxu1 %v9738_v5 }
 0x41d   :  { %v7855_v19 = vpop.eup %7854 }
 0x41e   :  { %v7857_v1 = vpop.eup %7856  ;;  %v4525_v40 = vmul.f32 %v7855_v19, %v9406_v52 }
 0x41f   :  { %v4524_v33 = vmul.f32 %v7857_v1, %v9408_v35 }
 0x420   :  { %7684 = vmatmul.mubr.msk.f32.vlgmr.msra.gmra.mxu1 %vm4439_vm3, %v4525_v40 }
 0x421   :  { %7665 = vmatmul.mubr.msk.f32.vlgmr.msra.gmra.mxu0 %vm4439_vm3, %v4524_v33  ;;  %7706 = vmatpush3.msra.mxu1 %v9271_v46  ;;  %v5114_v46 = vld [vmem:[%s9723_s7 + $0x10] sm:$0xff]  ;;  %v7878_v33 = vld [vmem:[%s9716_s0 + $0x8] sm:$0xff] }
 0x422   :  { %7687 = vmatpush3.msra.mxu0 %v9268_v41  ;;  %7707 = vmatprep.subr.mxu1 %v9738_v5 }
 0x423   :  { %7688 = vmatprep.subr.mxu0 %v9738_v5  ;;  %7708 = vmatpush3.msra.mxu1 %v3647_v32 }
 0x424   :  { %7689 = vmatpush3.msra.mxu0 %v3542_v8  ;;  %7709 = vmatprep.subr.mxu1 %v9738_v5  ;;  %v7879_v8 = vld [vmem:[%s9716_s0] sm:$0xff] }
 0x425   :  { %7690 = vmatprep.subr.mxu0 %v9738_v5  ;;  %7710 = vmatpush3.msra.mxu1 %v9251_v22 }
 0x426   :  { %7691 = vmatpush3.msra.mxu0 %v9248_v21  ;;  %7711 = vmatprep.subr.mxu1 %v9738_v5 }
 0x427   :  { %7692 = vmatprep.subr.mxu0 %v9738_v5  ;;  %7712 = vmatpush3.msra.mxu1 %v9259_v53 }
 0x428   :  { %7693 = vmatpush3.msra.mxu0 %v9256_v55  ;;  %7713 = vmatprep.subr.mxu1 %v9738_v5  ;;  %v9788_v55 = vld [vmem:[#allocation33_spill] sm:$0xff] }
 0x429   :  { %7694 = vmatprep.subr.mxu0 %v9738_v5  ;;  %7714 = vmatpush3.msra.mxu1 %v9231_v61 }
 0x42a   :  { %7695 = vmatpush3.msra.mxu0 %v9228_v39  ;;  %7715 = vmatprep.subr.mxu1 %v9738_v5 }
 0x42b   :  { %7696 = vmatprep.subr.mxu0 %v9738_v5  ;;  %7716 = vmatpush3.msra.mxu1 %v9239_v0  ;;  %v5113_v0 = vld [vmem:[%s9723_s7 + $0x8] sm:$0xff] }
 0x42c   :  { %7697 = vmatpush3.msra.mxu0 %v9236_v31  ;;  %7717 = vmatprep.subr.mxu1 %v9738_v5  ;;  %v5112_v31 = vld [vmem:[%s9723_s7] sm:$0xff] }
 0x42d   :  { %7698 = vmatprep.subr.mxu0 %v9738_v5  ;;  %7718 = vmatpush3.msra.mxu1 %v9211_v47 }
 0x42e   :  { %7699 = vmatpush3.msra.mxu0 %v9208_v50  ;;  %7719 = vmatprep.subr.mxu1 %v9738_v5 }
 0x42f   :  { %7700 = vmatprep.subr.mxu0 %v9738_v5  ;;  %7720 = vmatpush3.msra.mxu1 %v9219_v54  ;;  %v4511_v11 = vpop.xlane.xlu1 %4510 }
 0x430   :  { %7701 = vmatpush3.msra.mxu0 %v9788_v55  ;;  %7858 = vrcp.f32 %v4511_v11  ;;  %v4508_v39 = vpop.xlane.xlu0 %4507  ;;  %7702 = vmatprep.mubr.msk.f32.mxu0 %vm7903_vm1, %v9738_v5 }
 0x431   :  { %7860 = vrcp.f32 %v4508_v39  ;;  %7721 = vmatprep.mubr.msk.f32.mxu1 %vm7903_vm1, %v9738_v5  ;;  %7724 = vmatprep.subr.mxu0 %v9738_v5 }
 0x432   :  { %7729 = vmatprep.subr.mxu1 %v9738_v5 }
 0x43d   :  { %v7859_v50 = vpop.eup %7858 }
 0x43e   :  { %v7861_v47 = vpop.eup %7860  ;;  %v4527_v54 = vmul.f32 %v7859_v50, %v9414_v6 }
 0x43f   :  { %v4526_v61 = vmul.f32 %v7861_v47, %v9416_v7 }
 0x440   :  { %7722 = vmatmul.mubr.msk.f32.vlgmr.msra.gmra.mxu1 %vm4439_vm3, %v4527_v54 }
 0x441   :  { %7703 = vmatmul.mubr.msk.f32.vlgmr.msra.gmra.mxu0 %vm4439_vm3, %v4526_v61  ;;  %7730 = vmatpush3.msra.mxu1 %v5112_v31 }
 0x442   :  { %7725 = vmatpush3.msra.mxu0 %v5112_v31  ;;  %7726 = vmatprep.mubr.msk.f32.mxu0 %vm7903_vm1, %v9738_v5 }
 0x443   :  { %7731 = vmatprep.mubr.msk.f32.mxu1 %vm7903_vm1, %v9738_v5  ;;  %7734 = vmatprep.subr.mxu0 %v9738_v5 }
 0x444   :  { %7739 = vmatprep.subr.mxu1 %v9738_v5 }
 0x4a0   :  { %v4597_v21 = vpop.f32.mrf.mxu0 }
 0x4a1   :  { %7727 = vmatmul.mubr.msk.f32.vlgmr.msra.gmra.mxu0 %vm1942_vm2, %v4597_v21 }
 0x4a2   :  { %v7590_v22 = vpop.f32.mrf.mxu0  ;;  %7735 = vmatpush3.msra.mxu0 %v5113_v0  ;;  %7736 = vmatprep.mubr.msk.f32.mxu0 %vm7903_vm1, %v9738_v5 }
 0x4a3   :  { %7744 = vmatprep.subr.mxu0 %v9738_v5 }
 0x4a4   :  { %v4670_v53 = vpop.f32.mrf.mxu1 }
 0x4a5   :  { %7732 = vmatmul.mubr.msk.f32.vlgmr.msra.gmra.mxu1 %vm1942_vm2, %v4670_v53 }
 0x4a6   :  { %v7609_v41 = vpop.f32.mrf.mxu1  ;;  %7740 = vmatpush3.msra.mxu1 %v5113_v0  ;;  %7741 = vmatprep.mubr.msk.f32.mxu1 %vm7903_vm1, %v9738_v5 }
 0x4a7   :  { %7749 = vmatprep.subr.mxu1 %v9738_v5 }
 0x4c0   :  { %v4743_v25 = vpop.f32.mrf.mxu0 }
 0x4c1   :  { %7737 = vmatmul.mubr.msk.f32.vlgmr.msra.gmra.mxu0 %vm1942_vm2, %v4743_v25  ;;  %v5766_v25 = vld [vmem:[%s9724_s8 + $0x10] sm:$0xff] }
 0x4c2   :  { %v7628_v57 = vpop.f32.mrf.mxu0  ;;  %7745 = vmatpush3.msra.mxu0 %v5114_v46  ;;  %7746 = vmatprep.mubr.msk.f32.mxu0 %vm7903_vm1, %v9738_v5 }
 0x4c3   :  { %7754 = vmatprep.subr.mxu0 %v9738_v5  ;;  %v5765_v57 = vld [vmem:[%s9724_s8 + $0x8] sm:$0xff] }
 0x4c4   :  { %v4816_v52 = vpop.f32.mrf.mxu1 }
 0x4c5   :  { %7742 = vmatmul.mubr.msk.f32.vlgmr.msra.gmra.mxu1 %vm1942_vm2, %v4816_v52  ;;  %v5764_v52 = vld [vmem:[%s9724_s8] sm:$0xff] }
 0x4c6   :  { %v7647_v35 = vpop.f32.mrf.mxu1  ;;  %7750 = vmatpush3.msra.mxu1 %v5114_v46  ;;  %7751 = vmatprep.mubr.msk.f32.mxu1 %vm7903_vm1, %v9738_v5  ;;  %v5767_v46 = vld [vmem:[%s9724_s8 + $0x18] sm:$0xff]  ;;  %s6181_s8 = sshll.u32 %s7905_s19, 4  ;;  %s6182_s8 = int_to_ptr.vmem [resolvable:$true] %s6181_s8 }
 0x4c7   :  { %7759 = vmatprep.subr.mxu1 %v9738_v5  ;;  %s7880_s4 = scalar_lea.vmem %s6182_s8, 256  ;;  %p7885_p1 = scmp.lt.s32.totalorder %s6182_s8, %s6182_s8 }
 0x4c8   :  { %p7881_p0 = scmp.ne.s32.totalorder %s6182_s8, %s7880_s4  ;;  %p7886_p2 = scmp.lt.s32.totalorder %s7880_s4, %s7880_s4 }
 0x4ca   :  { %p7887_p3 = por %p7886_p2, %p7885_p1 }
 0x4cc   :  { %p7888_p4 = pnand %p7887_p3, %p7881_p0 }
 0x4e0   :  { %v4962_v6 = vpop.f32.mrf.mxu1 }
 0x4e1   :  { %v4889_v7 = vpop.f32.mrf.mxu0  ;;  %7752 = vmatmul.mubr.msk.f32.vlgmr.msra.gmra.mxu1 %vm1942_vm2, %v4962_v6 }
 0x4e2   :  { %7747 = vmatmul.mubr.msk.f32.vlgmr.msra.gmra.mxu0 %vm1942_vm2, %v4889_v7  ;;  %v7685_v29 = vpop.f32.mrf.mxu1  ;;  %7760 = vmatpush3.msra.mxu1 %v5115_v28 }
 0x4e3   :  { %v7666_v45 = vpop.f32.mrf.mxu0  ;;  %7755 = vmatpush3.msra.mxu0 %v5115_v28  ;;  %7756 = vmatprep.mubr.msk.f32.mxu0 %vm7903_vm1, %v9738_v5 }
 0x4e4   :  { %7761 = vmatprep.mubr.msk.f32.mxu1 %vm7903_vm1, %v9738_v5  ;;  %7764 = vmatprep.subr.mxu0 %v9738_v5 }
 0x4e5   :  { %7775 = vmatprep.subr.mxu1 %v9738_v5 }
 0x500   :  { %v5108_v4 = vpop.f32.mrf.mxu1 }
 0x501   :  { %v5035_v20 = vpop.f32.mrf.mxu0  ;;  %7762 = vmatmul.mubr.msk.f32.vlgmr.msra.gmra.mxu1 %vm1942_vm2, %v5108_v4 }
 0x502   :  { %7757 = vmatmul.mubr.msk.f32.vlgmr.msra.gmra.mxu0 %vm1942_vm2, %v5035_v20  ;;  %v7723_v60 = vpop.f32.mrf.mxu1  ;;  %7783 = vmatprep.mubr.msk.f32.mxu1 %vm7903_vm1, %v9738_v5  ;;  %v6470_v20 = vld [vmem:[%s9726_s10 + $0x1] ss:$0 sm:$0xff] }
 0x503   :  { %v7704_v16 = vpop.f32.mrf.mxu0  ;;  %7772 = vmatprep.mubr.msk.f32.mxu0 %vm7903_vm1, %v9738_v5  ;;  %7765 = vmatpush3.msra.mxu0 %v5767_v46 }
 0x504   :  { %7776 = vmatpush3.msra.mxu1 %v5767_v46  ;;  %7766 = vmatprep.subr.mxu0 %v9738_v5 }
 0x505   :  { %7777 = vmatprep.subr.mxu1 %v9738_v5  ;;  %7767 = vmatpush3.msra.mxu0 %v5766_v25 }
 0x506   :  { %7778 = vmatpush3.msra.mxu1 %v5766_v25  ;;  %7768 = vmatprep.subr.mxu0 %v9738_v5 }
 0x507   :  { %7779 = vmatprep.subr.mxu1 %v9738_v5  ;;  %7769 = vmatpush3.msra.mxu0 %v5765_v57 }
 0x508   :  { %7780 = vmatpush3.msra.mxu1 %v5765_v57  ;;  %7770 = vmatprep.subr.mxu0 %v9738_v5 }
 0x509   :  { %7781 = vmatprep.subr.mxu1 %v9738_v5  ;;  %7771 = vmatpush3.msra.mxu0 %v5764_v52 }
 0x50a   :  { %7782 = vmatpush3.msra.mxu1 %v5764_v52  ;;  %7786 = vmatprep.subr.mxu0 %v9738_v5 }
 0x50b   :  { %7805 = vmatprep.subr.mxu1 %v9738_v5 }
 0x561   :  { %v5185_v59 = vpop.f32.mrf.mxu0 }
 0x562   :  { %v5700_v36 = vsel %vm103_vm0, %v5185_v59, 0.0 }
 0x563   :  { %v7728_v62 = vpop.f32.mrf.mxu0 }
 0x564   :  { %v6471_v62 = vld [vmem:[%s9726_s10 + $0x2] ss:$0 sm:$0xff] }
 0x565   :  { %v5258_v23 = vpop.f32.mrf.mxu1 }
 0x566   :  { %v5707_v2 = vsel %vm103_vm0, %v5258_v23, 0.0 }
 0x567   :  { %v7733_v37 = vpop.f32.mrf.mxu1 }
 0x581   :  { %v5331_v44 = vpop.f32.mrf.mxu0 }
 0x582   :  { %v5701_v24 = vsel %vm103_vm0, %v5331_v44, 0.0 }
 0x583   :  { %v7738_v14 = vpop.f32.mrf.mxu0  ;;  %v5702_v51 = vadd.f32 %v5701_v24, %v5700_v36  ;;  %v5768_v24 = vld [vmem:[%s9725_s9] sm:$0xff] }
 0x585   :  { %v5404_v17 = vpop.f32.mrf.mxu1 }
 0x586   :  { %v5708_v18 = vsel %vm103_vm0, %v5404_v17, 0.0  ;;  %v5775_v17 = vld [vmem:[%s9725_s9 + $0x38] sm:$0xff] }
 0x587   :  { %v7743_v63 = vpop.f32.mrf.mxu1  ;;  %v5709_v30 = vadd.f32 %v5708_v18, %v5707_v2  ;;  %v5769_v18 = vld [vmem:[%s9725_s9 + $0x8] sm:$0xff]  ;;  %v6472_v2 = vld [vmem:[%s9726_s10 + $0x3] ss:$0 sm:$0xff] }
 0x588   :  { %v5774_v63 = vld [vmem:[%s9725_s9 + $0x30] sm:$0xff] }
 0x5a1   :  { %v5550_v13 = vpop.f32.mrf.mxu1 }
 0x5a2   :  { %v5477_v9 = vpop.f32.mrf.mxu0  ;;  %v5710_v3 = vsel %vm103_vm0, %v5550_v13, 0.0  ;;  %v5773_v13 = vld [vmem:[%s9725_s9 + $0x28] sm:$0xff] }
 0x5a3   :  { %v7753_v12 = vpop.f32.mrf.mxu1  ;;  %v5703_v34 = vsel %vm103_vm0, %v5477_v9, 0.0  ;;  %v5711_v58 = vadd.f32 %v5710_v3, %v5709_v30  ;;  %v5772_v9 = vld [vmem:[%s9725_s9 + $0x20] sm:$0xff] }
 0x5a4   :  { %v7748_v48 = vpop.f32.mrf.mxu0  ;;  %v5704_v27 = vadd.f32 %v5703_v34, %v5702_v51  ;;  %v5771_v12 = vld [vmem:[%s9725_s9 + $0x18] sm:$0xff] }
 0x5a5   :  { %v5770_v48 = vld [vmem:[%s9725_s9 + $0x10] sm:$0xff] }
 0x5c1   :  { %v5696_v26 = vpop.f32.mrf.mxu1 }
 0x5c2   :  { %v5623_v38 = vpop.f32.mrf.mxu0  ;;  %v5712_v15 = vsel %vm103_vm0, %v5696_v26, 0.0 }
 0x5c3   :  { %v5705_v43 = vsel %vm103_vm0, %v5623_v38, 0.0  ;;  %v5713_v49 = vadd.f32 %v5712_v15, %v5711_v58  ;;  %v7763_v10 = vpop.f32.mrf.mxu1 }
 0x5c4   :  { %v5706_v56 = vadd.f32 %v5705_v43, %v5704_v27  ;;  %v7758_v19 = vpop.f32.mrf.mxu0 }
 0x5c5   :  { %v5720_v1 = vadd.f32 %v6469_v42, %v5713_v49 }
 0x5c6   :  { %v5719_v40 = vadd.f32 %v6469_v42, %v5706_v56 }
 0x5c7   :  { %v5722_v32 = vadd.f32 %v7878_v33, %v5720_v1 }
 0x5c8   :  { %v5721_v11 = vadd.f32 %v7879_v8, %v5719_v40 }
 0x5c9   :  { %v5728_v55 = vsel %vm103_vm0, %v5722_v32, 0.0 }
 0x5ca   :  { %5729 = vadd.xlane.f32.xlu1 %v5728_v55  ;;  %v5725_v39 = vsel %vm103_vm0, %v5721_v11, 0.0 }
 0x5cb   :  { %5726 = vadd.xlane.f32.xlu0 %v5725_v39 }
 0x653   :  { %v5730_v50 = vpop.xlane.xlu1 %5729 }
 0x654   :  { %v5733_v47 = vmul.f32 0.03125, %v5730_v50  ;;  %v5727_v54 = vpop.xlane.xlu0 %5726 }
 0x655   :  { %v5732_v61 = vmul.f32 0.03125, %v5727_v54 }
 0x656   :  { %v5735_v31 = vsub.f32 %v5722_v32, %v5733_v47 }
 0x657   :  { %v5734_v0 = vsub.f32 %v5721_v11, %v5732_v61 }
 0x658   :  { %v5737_v21 = vmul.f32 %v5735_v31, %v5735_v31 }
 0x659   :  { %v5736_v22 = vmul.f32 %v5734_v0, %v5734_v0 }
 0x65a   :  { %v5741_v53 = vsel %vm103_vm0, %v5737_v21, 0.0 }
 0x65b   :  { %5742 = vadd.xlane.f32.xlu1 %v5741_v53  ;;  %v5738_v41 = vsel %vm103_vm0, %v5736_v22, 0.0 }
 0x65c   :  { %5739 = vadd.xlane.f32.xlu0 %v5738_v41 }
 0x6e4   :  { %v5743_v35 = vpop.xlane.xlu1 %5742 }
 0x6e5   :  { %v5745_v28 = vmul.f32 0.03125, %v5743_v35  ;;  %v5740_v6 = vpop.xlane.xlu0 %5739 }
 0x6e6   :  { %v5744_v7 = vmul.f32 0.03125, %v5740_v6 }
 0x6e7   :  { %v5747_v29 = vadd.f32 1e-07, %v5745_v28 }
 0x6e8   :  { %v5746_v45 = vadd.f32 1e-07, %v5744_v7 }
 0x6e9   :  { %7862 = vrsqrt.f32 %v5747_v29 }
 0x6ea   :  { %7864 = vrsqrt.f32 %v5746_v45 }
 0x6f6   :  { %v7863_v4 = vpop.eup %7862 }
 0x6f7   :  { %v7865_v60 = vpop.eup %7864  ;;  %v5751_v16 = vmul.f32 %v7863_v4, %v5735_v31 }
 0x6f8   :  { %v5750_v59 = vmul.f32 %v7865_v60, %v5734_v0 }
 0x6f9   :  { %v5757_v23 = vmul.f32 %v6470_v20, %v5751_v16 }
 0x6fa   :  { %v5756_v37 = vmul.f32 %v6470_v20, %v5750_v59 }
 0x6fb   :  { %v9641_v44 = vadd.f32 %v6471_v62, %v5757_v23 }
 0x6fc   :  { %v9643_v14 = vadd.f32 %v6471_v62, %v5756_v37 }
 0x6fd   :  { %7784 = vmatmul.mubr.msk.f32.vlgmr.msra.gmra.mxu1 %vm103_vm0, %v9641_v44 }
 0x6fe   :  { %7773 = vmatmul.mubr.msk.f32.vlgmr.msra.gmra.mxu0 %vm103_vm0, %v9643_v14  ;;  %7821 = vmatprep.mubr.msk.f32.mxu1 %vm7903_vm1, %v9738_v5 }
 0x6ff   :  { %7802 = vmatprep.mubr.msk.f32.mxu0 %vm7903_vm1, %v9738_v5  ;;  %7787 = vmatpush3.msra.mxu0 %v5775_v17 }
 0x700   :  { %7806 = vmatpush3.msra.mxu1 %v5775_v17  ;;  %7788 = vmatprep.subr.mxu0 %v9738_v5 }
 0x701   :  { %7807 = vmatprep.subr.mxu1 %v9738_v5  ;;  %7789 = vmatpush3.msra.mxu0 %v5774_v63 }
 0x702   :  { %7808 = vmatpush3.msra.mxu1 %v5774_v63  ;;  %7790 = vmatprep.subr.mxu0 %v9738_v5 }
 0x703   :  { %7809 = vmatprep.subr.mxu1 %v9738_v5  ;;  %7791 = vmatpush3.msra.mxu0 %v5773_v13 }
 0x704   :  { %7810 = vmatpush3.msra.mxu1 %v5773_v13  ;;  %7792 = vmatprep.subr.mxu0 %v9738_v5 }
 0x705   :  { %7811 = vmatprep.subr.mxu1 %v9738_v5  ;;  %7793 = vmatpush3.msra.mxu0 %v5772_v9 }
 0x706   :  { %7812 = vmatpush3.msra.mxu1 %v5772_v9  ;;  %7794 = vmatprep.subr.mxu0 %v9738_v5  ;;  %v6475_v9 = vld [vmem:[%s9726_s10 + $0x4] ss:$0 sm:$0xff] }
 0x707   :  { %7813 = vmatprep.subr.mxu1 %v9738_v5  ;;  %7795 = vmatpush3.msra.mxu0 %v5771_v12 }
 0x708   :  { %7814 = vmatpush3.msra.mxu1 %v5771_v12  ;;  %7796 = vmatprep.subr.mxu0 %v9738_v5 }
 0x709   :  { %7815 = vmatprep.subr.mxu1 %v9738_v5  ;;  %7797 = vmatpush3.msra.mxu0 %v5770_v48 }
 0x70a   :  { %7816 = vmatpush3.msra.mxu1 %v5770_v48  ;;  %7798 = vmatprep.subr.mxu0 %v9738_v5 }
 0x70b   :  { %7817 = vmatprep.subr.mxu1 %v9738_v5  ;;  %7799 = vmatpush3.msra.mxu0 %v5769_v18 }
 0x70c   :  { %7818 = vmatpush3.msra.mxu1 %v5769_v18  ;;  %7800 = vmatprep.subr.mxu0 %v9738_v5 }
 0x70d   :  { %7819 = vmatprep.subr.mxu1 %v9738_v5  ;;  %7801 = vmatpush3.msra.mxu0 %v5768_v24 }
 0x70e   :  { %7820 = vmatpush3.msra.mxu1 %v5768_v24 }
 0x7bd   :  { %v5923_v3 = vpop.f32.mrf.mxu1 }
 0x7be   :  { %v5850_v36 = vpop.f32.mrf.mxu0  ;;  %v5924_v30 = vadd.f32 %v6472_v2, %v5923_v3 }
 0x7bf   :  { %v5851_v34 = vadd.f32 %v6472_v2, %v5850_v36  ;;  %v7785_v51 = vpop.f32.mrf.mxu1 }
 0x7c0   :  { %v5930_v58 = vmul.f32 0.70710677, %v5924_v30  ;;  %v7774_v26 = vpop.f32.mrf.mxu0  ;;  %v5928_v62 = vmul.f32 0.5, %v5924_v30 }
 0x7c1   :  { %v5929_v27 = vmul.f32 0.70710677, %v5851_v34  ;;  %v5927_v37 = vmul.f32 0.5, %v5851_v34 }
 0x7c2   :  { %v5932_v38 = vand.u32 2147483647, %v5930_v58  ;;  %vm5972_vm4 = vcmp.ge.f32.partialorder %v5930_v58, 0.0 }
 0x7c3   :  { %v5931_v42 = vand.u32 2147483647, %v5929_v27  ;;  %vm5971_vm5 = vcmp.ge.f32.partialorder %v5929_v27, 0.0 }
 0x7c4   :  { %v5934_v15 = vmul.f32 0.3275911, %v5932_v38  ;;  %v5960_v10 = vsub.f32 0.0, %v5932_v38 }
 0x7c5   :  { %v5933_v43 = vmul.f32 0.3275911, %v5931_v42  ;;  %v5959_v56 = vsub.f32 0.0, %v5931_v42 }
 0x7c6   :  { %v5936_v49 = vadd.f32 1.0, %v5934_v15  ;;  %v5962_v19 = vmul.f32 %v5960_v10, %v5932_v38 }
 0x7c7   :  { %v5935_v5 = vadd.f32 1.0, %v5933_v43  ;;  %v5961_v1 = vmul.f32 %v5959_v56, %v5931_v42 }
 0x7c8   :  { %7866 = vrcp.f32 %v5936_v49  ;;  %v5965_v8 = vmul.f32 1.442695, %v5962_v19 }
 0x7c9   :  { %7868 = vrcp.f32 %v5935_v5  ;;  %v5963_v55 = vmul.f32 1.442695, %v5961_v1 }
 0x7ca   :  { %7870 = vpow2.f32 %v5965_v8 }
 0x7cb   :  { %7872 = vpow2.f32 %v5963_v55  ;;  %v6479_v55 = vld [vmem:[%s9726_s10 + $0x6] ss:$0 sm:$0xff] }
 0x7d5   :  { %v7867_v40 = vpop.eup %7866 }
 0x7d6   :  { %v7869_v33 = vpop.eup %7868  ;;  %v5942_v32 = vmul.f32 1.0614054, %v7867_v40 }
 0x7d7   :  { %v5941_v11 = vmul.f32 1.0614054, %v7869_v33  ;;  %v7871_v35 = vpop.eup %7870 }
 0x7d8   :  { %v5944_v39 = vadd.f32 -1.4531521, %v5942_v32  ;;  %v7873_v6 = vpop.eup %7872  ;;  %v6478_v32 = vld [vmem:[%s9726_s10 + $0x5] ss:$0 sm:$0xff] }
 0x7d9   :  { %v5943_v50 = vadd.f32 -1.4531521, %v5941_v11 }
 0x7da   :  { %v5946_v47 = vmul.f32 %v7867_v40, %v5944_v39 }
 0x7db   :  { %v5945_v54 = vmul.f32 %v7869_v33, %v5943_v50 }
 0x7dc   :  { %v5948_v61 = vadd.f32 1.4214138, %v5946_v47 }
 0x7dd   :  { %v5947_v31 = vadd.f32 1.4214138, %v5945_v54 }
 0x7de   :  { %v5950_v0 = vmul.f32 %v7867_v40, %v5948_v61 }
 0x7df   :  { %v5949_v21 = vmul.f32 %v7869_v33, %v5947_v31 }
 0x7e0   :  { %v5952_v22 = vadd.f32 -0.28449672, %v5950_v0 }
 0x7e1   :  { %v5951_v53 = vadd.f32 -0.28449672, %v5949_v21 }
 0x7e2   :  { %v5954_v41 = vmul.f32 %v7867_v40, %v5952_v22 }
 0x7e3   :  { %v5953_v46 = vmul.f32 %v7869_v33, %v5951_v53 }
 0x7e4   :  { %v5956_v25 = vadd.f32 0.2548296, %v5954_v41 }
 0x7e5   :  { %v5955_v57 = vadd.f32 0.2548296, %v5953_v46 }
 0x7e6   :  { %v5958_v52 = vmul.f32 %v7867_v40, %v5956_v25 }
 0x7e7   :  { %v5957_v28 = vmul.f32 %v7869_v33, %v5955_v57 }
 0x7e8   :  { %v5968_v7 = vmul.f32 %v7871_v35, %v5958_v52 }
 0x7e9   :  { %v5967_v29 = vmul.f32 %v7873_v6, %v5957_v28 }
 0x7ea   :  { %v5970_v45 = vsub.f32 1.0, %v5968_v7 }
 0x7eb   :  { %v5969_v4 = vsub.f32 1.0, %v5967_v29 }
 0x7ec   :  { %v5974_v20 = vsub.f32 0.0, %v5970_v45 }
 0x7ed   :  { %v5973_v60 = vsub.f32 0.0, %v5969_v4 }
 0x7ee   :  { %v5976_v16 = vsel %vm5972_vm4, %v5970_v45, %v5974_v20 }
 0x7ef   :  { %v5975_v59 = vsel %vm5971_vm5, %v5969_v4, %v5973_v60  ;;  %v5978_v23 = vadd.f32 1.0, %v5976_v16 }
 0x7f0   :  { %v5977_v17 = vadd.f32 1.0, %v5975_v59 }
 0x7f1   :  { %v5980_v63 = vmul.f32 %v5978_v23, %v5928_v62 }
 0x7f2   :  { %v5979_v13 = vmul.f32 %v5977_v17, %v5927_v37 }
 0x7f3   :  { %7822 = vmatmul.mubr.msk.f32.vlgmr.msra.gmra.mxu1 %vm4439_vm3, %v5980_v63 }
 0x7f4   :  { %7803 = vmatmul.mubr.msk.f32.vlgmr.msra.gmra.mxu0 %vm4439_vm3, %v5979_v13 }
 0x8b3   :  { %v6128_v12 = vpop.f32.mrf.mxu1 }
 0x8b4   :  { %v6055_v48 = vpop.f32.mrf.mxu0  ;;  %v6129_v18 = vadd.f32 %v6475_v9, %v6128_v12 }
 0x8b5   :  { %v6056_v24 = vadd.f32 %v6475_v9, %v6055_v48  ;;  %v7823_v2 = vpop.f32.mrf.mxu1 }
 0x8b6   :  { %v7804_v3 = vpop.f32.mrf.mxu0  ;;  %v6133_v36 = vadd.f32 %v6129_v18, %v9641_v44 }
 0x8b7   :  { %v6132_v30 = vadd.f32 %v6056_v24, %v9643_v14 }
 0x8b8   :  { %v6139_v34 = vsel %vm103_vm0, %v6133_v36, 0.0 }
 0x8b9   :  { %6140 = vadd.xlane.f32.xlu1 %v6139_v34  ;;  %v6136_v51 = vsel %vm103_vm0, %v6132_v30, 0.0 }
 0x8ba   :  { %6137 = vadd.xlane.f32.xlu0 %v6136_v51 }
 0x942   :  { %v6141_v58 = vpop.xlane.xlu1 %6140 }
 0x943   :  { %v6143_v26 = vmul.f32 0.03125, %v6141_v58  ;;  %v6138_v27 = vpop.xlane.xlu0 %6137 }
 0x944   :  { %v6142_v38 = vmul.f32 0.03125, %v6138_v27 }
 0x945   :  { %v6145_v42 = vsub.f32 %v6133_v36, %v6143_v26 }
 0x946   :  { %v6144_v15 = vsub.f32 %v6132_v30, %v6142_v38 }
 0x947   :  { %v6147_v43 = vmul.f32 %v6145_v42, %v6145_v42 }
 0x948   :  { %v6146_v49 = vmul.f32 %v6144_v15, %v6144_v15 }
 0x949   :  { %v6151_v5 = vsel %vm103_vm0, %v6147_v43, 0.0 }
 0x94a   :  { %6152 = vadd.xlane.f32.xlu1 %v6151_v5  ;;  %v6148_v44 = vsel %vm103_vm0, %v6146_v49, 0.0 }
 0x94b   :  { %6149 = vadd.xlane.f32.xlu0 %v6148_v44 }
 0x9d3   :  { %v6153_v14 = vpop.xlane.xlu1 %6152 }
 0x9d4   :  { %v6155_v10 = vmul.f32 0.03125, %v6153_v14  ;;  %v6150_v56 = vpop.xlane.xlu0 %6149 }
 0x9d5   :  { %v6154_v19 = vmul.f32 0.03125, %v6150_v56 }
 0x9d6   :  { %v6157_v1 = vadd.f32 1e-07, %v6155_v10 }
 0x9d7   :  { %v6156_v40 = vadd.f32 1e-07, %v6154_v19 }
 0x9d8   :  { %7874 = vrsqrt.f32 %v6157_v1 }
 0x9d9   :  { %7876 = vrsqrt.f32 %v6156_v40 }
 0x9e5   :  { %v7875_v33 = vpop.eup %7874 }
 0x9e6   :  { %v7877_v8 = vpop.eup %7876  ;;  %v6161_v11 = vmul.f32 %v7875_v33, %v6145_v42 }
 0x9e7   :  { %v6160_v39 = vmul.f32 %v7877_v8, %v6144_v15 }
 0x9e8   :  { %v6167_v50 = vmul.f32 %v6478_v32, %v6161_v11 }
 0x9e9   :  { %v6166_v47 = vmul.f32 %v6478_v32, %v6160_v39 }
 0x9ea   :  { %v6173_v54 = vadd.f32 %v6479_v55, %v6167_v50 }
 0x9eb   :  { %v6172_v61 = vadd.f32 %v6479_v55, %v6166_v47 }
 0x9ec   :  { %6175 = vst.msk [vmem:[#allocation2 + $0x8] sm:$0xff] %vm103_vm0, %v6173_v54 }
 0x9ed   :  { %6174 = vst.msk [vmem:[#allocation2] sm:$0xff] %vm103_vm0, %v6172_v61 }
 0x9ee   :  { %7891 = shalt.err (!%p7888_p4)
}
 0x9ef   :  { %s7906_s10 = smov 128   ;;  %s7907_s20 = smov 8  }
 0x9f0   :  { %6187 = dma.vmem_to_hbm [thread:$0]  %s6182_s8, 256, %s9727_s11, [#allocation3], %s7906_s10, %s7906_s10, %s7907_s20  }
 0x9f1   :  { %7900 = dma.done.wait [#allocation3], 256  }
 0x9f2   :  { %7901 = vsyncadd [#allocation3], 4294967040 }
 0x9f3   :  { %6191 = vsyncpa [#allocation3], 1 }

</bundles_post_ra>
